<compile_context>
chip_gen: v5e
topology: v5e:2x2
jax: 0.10.0
libtpu: 0.0.40
codegen_flags: <defaults>
</compile_context>

<pallas_src>
import functools

import jax
import jax.numpy as jnp
import numpy as np
from jax.experimental import pallas as pl
from jax.experimental.pallas import tpu as pltpu


# ------------------------------ fused kernel ---------------------------------

def _lenet_fused_kernel(x_ref, w1b_ref, b1v_ref, w2b_ref, b2v_ref,
                        fc1w_ref, fc1b_ref, fc2w_ref, fc2b_ref,
                        fc3w_ref, fc3b_ref, out_ref, p1_ref, p2_ref):
    f32 = jnp.float32

    def dot(a, b):
        return jnp.dot(a, b, preferred_element_type=f32)

    def row_pick(h_out, h_in, off):
        # S[p, r] = 1 iff r == 2p + off  ->  (S @ A) gathers rows 2p+off of A.
        r = jax.lax.broadcasted_iota(jnp.int32, (h_out, h_in), 1)
        p = jax.lax.broadcasted_iota(jnp.int32, (h_out, h_in), 0)
        return (r == 2 * p + off).astype(f32)

    def col_pick(l_in, l_out, off):
        # C[k, j] = 1 iff k == 2j + off  ->  (A @ C) gathers lanes 2j+off of A.
        k = jax.lax.broadcasted_iota(jnp.int32, (l_in, l_out), 0)
        j = jax.lax.broadcasted_iota(jnp.int32, (l_in, l_out), 1)
        return (k == 2 * j + off).astype(f32)

    def maxpool_2x2(y, h_in, h_out, l_in, l_out):
        # 2x2 / stride-2 max pool via gather-matmuls (MXU) + elementwise max.
        rows = jnp.maximum(dot(row_pick(h_out, h_in, 0), y),
                           dot(row_pick(h_out, h_in, 1), y))
        return jnp.maximum(dot(rows, col_pick(l_in, l_out, 0)),
                           dot(rows, col_pick(l_in, l_out, 1)))

    # --- conv1 (5x5, 1->6) + bias + ReLU ------------------------------------
    # output y1: (24, 144), lane = 24*c + ow
    acc1 = dot(x_ref[0:24, :], w1b_ref[0])
    for i in range(1, 5):
        acc1 = acc1 + dot(x_ref[i:i + 24, :], w1b_ref[i])
    y1 = jnp.maximum(acc1 + b1v_ref[...], 0.0)

    # --- maxpool 2x2 -> p1: (12, 72), lane = 12*c + pw ----------------------
    p1_ref[...] = maxpool_2x2(y1, 24, 12, 144, 72)

    # --- conv2 (5x5, 6->16) + bias + ReLU -----------------------------------
    # output y2: (8, 128), lane = 8*cout + ow  (exactly 128 lanes: lane-dense)
    acc2 = dot(p1_ref[0:8, :], w2b_ref[0])
    for i in range(1, 5):
        acc2 = acc2 + dot(p1_ref[i:i + 8, :], w2b_ref[i])
    y2 = jnp.maximum(acc2 + b2v_ref[...], 0.0)

    # --- maxpool 2x2 -> p2: (4, 64), lane = 4*cout + pw ---------------------
    p2_ref[...] = maxpool_2x2(y2, 8, 4, 128, 64)

    # --- fc1 (256 -> 120, padded to 128): accumulate over the 4 pooled rows --
    # fc1 weights are pre-permuted so row order matches (ph, 4*cout + pw).
    h = fc1b_ref[...]
    for ph in range(4):
        h = h + dot(p2_ref[ph:ph + 1, :], fc1w_ref[ph])
    h1 = jnp.maximum(h, 0.0)                                            # (1,128)

    # --- fc2 (120->84) + ReLU, fc3 (84->num_classes), all padded to 128 -----
    h2 = jnp.maximum(dot(h1, fc2w_ref[...]) + fc2b_ref[...], 0.0)        # (1,128)
    out_ref[...] = dot(h2, fc3w_ref[...]) + fc3b_ref[...]                # (1,128)


# --------------------------- parameter preparation ----------------------------

def init_params(key, num_classes=10):
    """PyTorch-equivalent parameters (HWIO convs, (in, out) fc weights)."""
    ks = jax.random.split(key, 10)

    def u(k, shape, fan_in):
        bound = 1.0 / (fan_in ** 0.5)
        return jax.random.uniform(k, shape, jnp.float32, -bound, bound)

    return {
        "conv1_w": u(ks[0], (5, 5, 1, 6), 1 * 5 * 5),
        "conv1_b": u(ks[1], (6,), 1 * 5 * 5),
        "conv2_w": u(ks[2], (5, 5, 6, 16), 6 * 5 * 5),
        "conv2_b": u(ks[3], (16,), 6 * 5 * 5),
        "fc1_w":   u(ks[4], (16 * 4 * 4, 120), 16 * 4 * 4),
        "fc1_b":   u(ks[5], (120,), 16 * 4 * 4),
        "fc2_w":   u(ks[6], (120, 84), 120),
        "fc2_b":   u(ks[7], (84,), 120),
        "fc3_w":   u(ks[8], (84, num_classes), 84),
        "fc3_b":   u(ks[9], (84,) if False else (num_classes,), 84),
    }


def prepare_kernel_weights(params, num_classes=10):
    """One-time host-side repack of the weights into kernel-friendly layouts."""
    assert num_classes <= 128
    f32 = np.float32
    w1 = np.asarray(params["conv1_w"], f32)    # (5,5,1,6)
    b1 = np.asarray(params["conv1_b"], f32)    # (6,)
    w2 = np.asarray(params["conv2_w"], f32)    # (5,5,6,16)
    b2 = np.asarray(params["conv2_b"], f32)    # (16,)
    fc1w = np.asarray(params["fc1_w"], f32)    # (256,120)
    fc1b = np.asarray(params["fc1_b"], f32)
    fc2w = np.asarray(params["fc2_w"], f32)    # (120,84)
    fc2b = np.asarray(params["fc2_b"], f32)
    fc3w = np.asarray(params["fc3_w"], f32)    # (84,nc)
    fc3b = np.asarray(params["fc3_b"], f32)

    # conv1 folded taps: per kernel row i, a (28, 144) slab so that
    #   y1[oh, 24c+ow] = sum_i (x[i:i+24, :] @ w1big[i])[oh, 24c+ow]
    w1big = np.zeros((5, 28, 6 * 24), f32)
    for i in range(5):
        for j in range(5):
            for ow in range(24):
                w1big[i, ow + j, 24 * np.arange(6) + ow] = w1[i, j, 0, :]
    b1v = np.repeat(b1, 24)[None, :]                      # (1,144): lane 24c+ow

    # conv2 folded taps: per kernel row i, a (72, 128) slab; p1 lane = 12*cin+w.
    w2big = np.zeros((5, 6 * 12, 16 * 8), f32)
    for i in range(5):
        for j in range(5):
            for cin in range(6):
                for ow in range(8):
                    w2big[i, 12 * cin + ow + j,
                          8 * np.arange(16) + ow] = w2[i, j, cin, :]
    b2v = np.repeat(b2, 8)[None, :]                       # (1,128): lane 8cout+ow

    # fc1: reorder rows from PyTorch flatten f = 16c + 4h + w to kernel order
    # r = 64h + 4c + w, pad outputs 120->128, split by pooled row h -> (4,64,128).
    fc1p = fc1w.reshape(16, 4, 4, 120).transpose(1, 0, 2, 3).reshape(256, 120)
    fc1k = np.zeros((4, 64, 128), f32)
    fc1k[:, :, :120] = fc1p.reshape(4, 64, 120)
    fc1bk = np.zeros((1, 128), f32); fc1bk[0, :120] = fc1b

    fc2k = np.zeros((128, 128), f32); fc2k[:120, :84] = fc2w
    fc2bk = np.zeros((1, 128), f32); fc2bk[0, :84] = fc2b

    fc3k = np.zeros((128, 128), f32); fc3k[:84, :num_classes] = fc3w
    fc3bk = np.zeros((1, 128), f32); fc3bk[0, :num_classes] = fc3b

    host = dict(w1big=w1big, b1v=b1v, w2big=w2big, b2v=b2v,
                fc1w=fc1k, fc1b=fc1bk, fc2w=fc2k, fc2b=fc2bk,
                fc3w=fc3k, fc3b=fc3bk)
    return {k: jnp.asarray(v) for k, v in host.items()}


# ------------------------------- forward pass ---------------------------------

def net_forward(kernel_weights, x_nchw, num_classes=10):
    n, c, hh, ww = x_nchw.shape
    assert c == 1 and hh == 28 and ww == 28, "Net requires (N, 1, 28, 28) input"
    x = x_nchw.reshape(n, 28, 28).astype(jnp.float32)   # Cin=1: NCHW == NHWC
    kw = kernel_weights

    const3 = lambda b: (0, 0, 0)
    const2 = lambda b: (0, 0)

    out = pl.pallas_call(
        _lenet_fused_kernel,
        out_shape=jax.ShapeDtypeStruct((n, 1, 128), jnp.float32),
        grid_spec=pltpu.PrefetchScalarGridSpec(
            num_scalar_prefetch=0,
            grid=(n,),
            in_specs=[
                pl.BlockSpec((None, 28, 28), lambda b: (b, 0, 0)),   # x (per sample)
                pl.BlockSpec((5, 28, 144), const3),                  # conv1 folded taps
                pl.BlockSpec((1, 144), const2),                      # conv1 bias
                pl.BlockSpec((5, 72, 128), const3),                  # conv2 folded taps
                pl.BlockSpec((1, 128), const2),                      # conv2 bias
                pl.BlockSpec((4, 64, 128), const3),                  # fc1 (permuted, padded)
                pl.BlockSpec((1, 128), const2),                      # fc1 bias
                pl.BlockSpec((128, 128), const2),                    # fc2 (padded)
                pl.BlockSpec((1, 128), const2),                      # fc2 bias
                pl.BlockSpec((128, 128), const2),                    # fc3 (padded)
                pl.BlockSpec((1, 128), const2),                      # fc3 bias
            ],
            out_specs=pl.BlockSpec((None, 1, 128), lambda b: (b, 0, 0)),
            scratch_shapes=[
                pltpu.VMEM((12, 72), jnp.float32),    # pooled conv1 activations
                pltpu.VMEM((4, 64), jnp.float32),     # pooled conv2 activations
            ],
        ),
        compiler_params=pltpu.CompilerParams(
            dimension_semantics=("parallel",)),
    )(x, kw["w1big"], kw["b1v"], kw["w2big"], kw["b2v"],
      kw["fc1w"], kw["fc1b"], kw["fc2w"], kw["fc2b"], kw["fc3w"], kw["fc3b"])

    return out.reshape(n, 128)[:, :num_classes]


# ------------------------------ plain-JAX reference ---------------------------

def reference_forward(params, x_nchw):
    hi = jax.lax.Precision.HIGHEST
    x = jnp.transpose(x_nchw, (0, 2, 3, 1)).astype(jnp.float32)   # NHWC

    def conv_relu(x, w, b):
        y = jax.lax.conv_general_dilated(
            x, w, window_strides=(1, 1), padding="VALID",
            dimension_numbers=("NHWC", "HWIO", "NHWC"), precision=hi)
        return jnp.maximum(y + b, 0.0)

    def pool(x):
        return jax.lax.reduce_window(x, -jnp.inf, jax.lax.max,
                                     (1, 2, 2, 1), (1, 2, 2, 1), "VALID")

    x = pool(conv_relu(x, params["conv1_w"], params["conv1_b"]))
    x = pool(conv_relu(x, params["conv2_w"], params["conv2_b"]))
    n = x.shape[0]
    x = jnp.transpose(x, (0, 3, 1, 2)).reshape(n, 16 * 4 * 4)     # PyTorch view order
    x = jnp.maximum(jnp.dot(x, params["fc1_w"], precision=hi) + params["fc1_b"], 0.0)
    x = jnp.maximum(jnp.dot(x, params["fc2_w"], precision=hi) + params["fc2_b"], 0.0)
    return jnp.dot(x, params["fc3_w"], precision=hi) + params["fc3_b"]


# ------------------------------------ main -------------------------------------

if __name__ == "__main__":
    key = jax.random.PRNGKey(0)
    pkey, xkey = jax.random.split(key)
    num_classes = 10
    params = init_params(pkey, num_classes=num_classes)
    kernel_weights = prepare_kernel_weights(params, num_classes=num_classes)

    # 28x28 input is required by the module (16*4*4 = 256 must match fc1).
    x = jax.random.normal(xkey, (2, 1, 28, 28), dtype=jnp.float32)   # NCHW

    fwd = jax.jit(functools.partial(net_forward, num_classes=num_classes))
    out = jax.block_until_ready(fwd(kernel_weights, x))
    assert out.shape == (2, num_classes) and out.dtype == jnp.float32

    ref = jax.block_until_ready(reference_forward(params, x))
    np.testing.assert_allclose(np.asarray(out), np.asarray(ref),
                               rtol=5e-3, atol=5e-3)
    print("KERNEL_OK")
</pallas_src>

<mosaic_0001>
module attributes {stable_mosaic.version = 11 : i64} {
  func.func @_lenet_fused_kernel(%arg0: i32, %arg1: memref<1x28x28xf32, #tpu.memory_space<vmem>>, %arg2: memref<5x28x144xf32, #tpu.memory_space<vmem>>, %arg3: memref<1x144xf32, #tpu.memory_space<vmem>>, %arg4: memref<5x72x128xf32, #tpu.memory_space<vmem>>, %arg5: memref<1x128xf32, #tpu.memory_space<vmem>>, %arg6: memref<4x64x128xf32, #tpu.memory_space<vmem>>, %arg7: memref<1x128xf32, #tpu.memory_space<vmem>>, %arg8: memref<128x128xf32, #tpu.memory_space<vmem>>, %arg9: memref<1x128xf32, #tpu.memory_space<vmem>>, %arg10: memref<128x128xf32, #tpu.memory_space<vmem>>, %arg11: memref<1x128xf32, #tpu.memory_space<vmem>>, %arg12: memref<1x1x128xf32, #tpu.memory_space<vmem>>, %arg13: memref<12x72xf32, #tpu.memory_space<vmem>>, %arg14: memref<4x64xf32, #tpu.memory_space<vmem>>) attributes {dimension_semantics = [#tpu.dimension_semantics<parallel>], iteration_bounds = array<i64: 2>, scalar_prefetch = 0 : i64, scratch_operands = 2 : i64, tpu.core_type = #tpu.core_type<tc>, window_params = [{transform_indices = @transform_0, window_bounds = array<i64: 1, 28, 28>}, {pipeline_mode = #tpu.pipeline_mode<synchronous>, transform_indices = @transform_1, window_bounds = array<i64: 5, 28, 144>}, {pipeline_mode = #tpu.pipeline_mode<synchronous>, transform_indices = @transform_2, window_bounds = array<i64: 1, 144>}, {pipeline_mode = #tpu.pipeline_mode<synchronous>, transform_indices = @transform_3, window_bounds = array<i64: 5, 72, 128>}, {pipeline_mode = #tpu.pipeline_mode<synchronous>, transform_indices = @transform_4, window_bounds = array<i64: 1, 128>}, {pipeline_mode = #tpu.pipeline_mode<synchronous>, transform_indices = @transform_5, window_bounds = array<i64: 4, 64, 128>}, {pipeline_mode = #tpu.pipeline_mode<synchronous>, transform_indices = @transform_6, window_bounds = array<i64: 1, 128>}, {pipeline_mode = #tpu.pipeline_mode<synchronous>, transform_indices = @transform_7, window_bounds = array<i64: 128, 128>}, {pipeline_mode = #tpu.pipeline_mode<synchronous>, transform_indices = @transform_8, window_bounds = array<i64: 1, 128>}, {pipeline_mode = #tpu.pipeline_mode<synchronous>, transform_indices = @transform_9, window_bounds = array<i64: 128, 128>}, {pipeline_mode = #tpu.pipeline_mode<synchronous>, transform_indices = @transform_10, window_bounds = array<i64: 1, 128>}, {transform_indices = @transform_11, window_bounds = array<i64: 1, 1, 128>}]} {
    %c0 = arith.constant 0 : index
    %c0_0 = arith.constant 0 : index
    %c0_1 = arith.constant 0 : index
    %0 = vector.load %arg1[%c0, %c0_0, %c0_1] : memref<1x28x28xf32, #tpu.memory_space<vmem>>, vector<1x24x28xf32>
    %1 = vector.shape_cast %0 : vector<1x24x28xf32> to vector<24x28xf32>
    %c0_2 = arith.constant 0 : index
    %c0_3 = arith.constant 0 : index
    %c0_4 = arith.constant 0 : index
    %2 = vector.load %arg2[%c0_2, %c0_3, %c0_4] : memref<5x28x144xf32, #tpu.memory_space<vmem>>, vector<1x28x144xf32>
    %3 = vector.shape_cast %2 : vector<1x28x144xf32> to vector<28x144xf32>
    %cst = arith.constant dense<0.000000e+00> : vector<24x144xf32>
    %4 = tpu.matmul %1, %3, %cst {dimension_numbers = #tpu.dot_dimension_numbers<[1], [0], [0], [1], [0, 0, 1, 1], [], []>} : vector<24x28xf32>, vector<28x144xf32>, vector<24x144xf32> -> vector<24x144xf32>
    %c0_5 = arith.constant 0 : index
    %c1 = arith.constant 1 : index
    %c0_6 = arith.constant 0 : index
    %5 = vector.load %arg1[%c0_5, %c1, %c0_6] : memref<1x28x28xf32, #tpu.memory_space<vmem>>, vector<1x24x28xf32>
    %6 = vector.shape_cast %5 : vector<1x24x28xf32> to vector<24x28xf32>
    %c1_7 = arith.constant 1 : index
    %c0_8 = arith.constant 0 : index
    %c0_9 = arith.constant 0 : index
    %7 = vector.load %arg2[%c1_7, %c0_8, %c0_9] : memref<5x28x144xf32, #tpu.memory_space<vmem>>, vector<1x28x144xf32>
    %8 = vector.shape_cast %7 : vector<1x28x144xf32> to vector<28x144xf32>
    %cst_10 = arith.constant dense<0.000000e+00> : vector<24x144xf32>
    %9 = tpu.matmul %6, %8, %cst_10 {dimension_numbers = #tpu.dot_dimension_numbers<[1], [0], [0], [1], [0, 0, 1, 1], [], []>} : vector<24x28xf32>, vector<28x144xf32>, vector<24x144xf32> -> vector<24x144xf32>
    %10 = arith.addf %4, %9 : vector<24x144xf32>
    %c0_11 = arith.constant 0 : index
    %c2 = arith.constant 2 : index
    %c0_12 = arith.constant 0 : index
    %11 = vector.load %arg1[%c0_11, %c2, %c0_12] : memref<1x28x28xf32, #tpu.memory_space<vmem>>, vector<1x24x28xf32>
    %12 = vector.shape_cast %11 : vector<1x24x28xf32> to vector<24x28xf32>
    %c2_13 = arith.constant 2 : index
    %c0_14 = arith.constant 0 : index
    %c0_15 = arith.constant 0 : index
    %13 = vector.load %arg2[%c2_13, %c0_14, %c0_15] : memref<5x28x144xf32, #tpu.memory_space<vmem>>, vector<1x28x144xf32>
    %14 = vector.shape_cast %13 : vector<1x28x144xf32> to vector<28x144xf32>
    %cst_16 = arith.constant dense<0.000000e+00> : vector<24x144xf32>
    %15 = tpu.matmul %12, %14, %cst_16 {dimension_numbers = #tpu.dot_dimension_numbers<[1], [0], [0], [1], [0, 0, 1, 1], [], []>} : vector<24x28xf32>, vector<28x144xf32>, vector<24x144xf32> -> vector<24x144xf32>
    %16 = arith.addf %10, %15 : vector<24x144xf32>
    %c0_17 = arith.constant 0 : index
    %c3 = arith.constant 3 : index
    %c0_18 = arith.constant 0 : index
    %17 = vector.load %arg1[%c0_17, %c3, %c0_18] : memref<1x28x28xf32, #tpu.memory_space<vmem>>, vector<1x24x28xf32>
    %18 = vector.shape_cast %17 : vector<1x24x28xf32> to vector<24x28xf32>
    %c3_19 = arith.constant 3 : index
    %c0_20 = arith.constant 0 : index
    %c0_21 = arith.constant 0 : index
    %19 = vector.load %arg2[%c3_19, %c0_20, %c0_21] : memref<5x28x144xf32, #tpu.memory_space<vmem>>, vector<1x28x144xf32>
    %20 = vector.shape_cast %19 : vector<1x28x144xf32> to vector<28x144xf32>
    %cst_22 = arith.constant dense<0.000000e+00> : vector<24x144xf32>
    %21 = tpu.matmul %18, %20, %cst_22 {dimension_numbers = #tpu.dot_dimension_numbers<[1], [0], [0], [1], [0, 0, 1, 1], [], []>} : vector<24x28xf32>, vector<28x144xf32>, vector<24x144xf32> -> vector<24x144xf32>
    %22 = arith.addf %16, %21 : vector<24x144xf32>
    %c0_23 = arith.constant 0 : index
    %c4 = arith.constant 4 : index
    %c0_24 = arith.constant 0 : index
    %23 = vector.load %arg1[%c0_23, %c4, %c0_24] : memref<1x28x28xf32, #tpu.memory_space<vmem>>, vector<1x24x28xf32>
    %24 = vector.shape_cast %23 : vector<1x24x28xf32> to vector<24x28xf32>
    %c4_25 = arith.constant 4 : index
    %c0_26 = arith.constant 0 : index
    %c0_27 = arith.constant 0 : index
    %25 = vector.load %arg2[%c4_25, %c0_26, %c0_27] : memref<5x28x144xf32, #tpu.memory_space<vmem>>, vector<1x28x144xf32>
    %26 = vector.shape_cast %25 : vector<1x28x144xf32> to vector<28x144xf32>
    %cst_28 = arith.constant dense<0.000000e+00> : vector<24x144xf32>
    %27 = tpu.matmul %24, %26, %cst_28 {dimension_numbers = #tpu.dot_dimension_numbers<[1], [0], [0], [1], [0, 0, 1, 1], [], []>} : vector<24x28xf32>, vector<28x144xf32>, vector<24x144xf32> -> vector<24x144xf32>
    %28 = arith.addf %22, %27 : vector<24x144xf32>
    %c0_29 = arith.constant 0 : index
    %c0_30 = arith.constant 0 : index
    %29 = vector.load %arg3[%c0_29, %c0_30] : memref<1x144xf32, #tpu.memory_space<vmem>>, vector<1x144xf32>
    %30 = vector.broadcast %29 : vector<1x144xf32> to vector<24x144xf32>
    %31 = arith.addf %28, %30 : vector<24x144xf32>
    %cst_31 = arith.constant 0.000000e+00 : f32
    %32 = vector.broadcast %cst_31 : f32 to vector<24x144xf32>
    %33 = arith.maximumf %31, %32 : vector<24x144xf32>
    %34 = tpu.iota {dimensions = array<i32: 1>} : vector<12x24xi32>
    %35 = tpu.iota {dimensions = array<i32: 0>} : vector<12x24xi32>
    %c2_i32 = arith.constant 2 : i32
    %36 = vector.broadcast %c2_i32 : i32 to vector<12x24xi32>
    %37 = arith.muli %36, %35 : vector<12x24xi32>
    %c0_i32 = arith.constant 0 : i32
    %38 = vector.broadcast %c0_i32 : i32 to vector<12x24xi32>
    %39 = arith.addi %37, %38 : vector<12x24xi32>
    %40 = arith.cmpi eq, %34, %39 : vector<12x24xi32>
    %41 = arith.extui %40 : vector<12x24xi1> to vector<12x24xi32>
    %42 = arith.sitofp %41 : vector<12x24xi32> to vector<12x24xf32>
    %cst_32 = arith.constant dense<0.000000e+00> : vector<12x144xf32>
    %43 = tpu.matmul %42, %33, %cst_32 {dimension_numbers = #tpu.dot_dimension_numbers<[1], [0], [0], [1], [0, 0, 1, 1], [], []>} : vector<12x24xf32>, vector<24x144xf32>, vector<12x144xf32> -> vector<12x144xf32>
    %44 = tpu.iota {dimensions = array<i32: 1>} : vector<12x24xi32>
    %45 = tpu.iota {dimensions = array<i32: 0>} : vector<12x24xi32>
    %c2_i32_33 = arith.constant 2 : i32
    %46 = vector.broadcast %c2_i32_33 : i32 to vector<12x24xi32>
    %47 = arith.muli %46, %45 : vector<12x24xi32>
    %c1_i32 = arith.constant 1 : i32
    %48 = vector.broadcast %c1_i32 : i32 to vector<12x24xi32>
    %49 = arith.addi %47, %48 : vector<12x24xi32>
    %50 = arith.cmpi eq, %44, %49 : vector<12x24xi32>
    %51 = arith.extui %50 : vector<12x24xi1> to vector<12x24xi32>
    %52 = arith.sitofp %51 : vector<12x24xi32> to vector<12x24xf32>
    %cst_34 = arith.constant dense<0.000000e+00> : vector<12x144xf32>
    %53 = tpu.matmul %52, %33, %cst_34 {dimension_numbers = #tpu.dot_dimension_numbers<[1], [0], [0], [1], [0, 0, 1, 1], [], []>} : vector<12x24xf32>, vector<24x144xf32>, vector<12x144xf32> -> vector<12x144xf32>
    %54 = arith.maximumf %43, %53 : vector<12x144xf32>
    %55 = tpu.iota {dimensions = array<i32: 0>} : vector<144x72xi32>
    %56 = tpu.iota {dimensions = array<i32: 1>} : vector<144x72xi32>
    %c2_i32_35 = arith.constant 2 : i32
    %57 = vector.broadcast %c2_i32_35 : i32 to vector<144x72xi32>
    %58 = arith.muli %57, %56 : vector<144x72xi32>
    %c0_i32_36 = arith.constant 0 : i32
    %59 = vector.broadcast %c0_i32_36 : i32 to vector<144x72xi32>
    %60 = arith.addi %58, %59 : vector<144x72xi32>
    %61 = arith.cmpi eq, %55, %60 : vector<144x72xi32>
    %62 = arith.extui %61 : vector<144x72xi1> to vector<144x72xi32>
    %63 = arith.sitofp %62 : vector<144x72xi32> to vector<144x72xf32>
    %cst_37 = arith.constant dense<0.000000e+00> : vector<12x72xf32>
    %64 = tpu.matmul %54, %63, %cst_37 {dimension_numbers = #tpu.dot_dimension_numbers<[1], [0], [0], [1], [0, 0, 1, 1], [], []>} : vector<12x144xf32>, vector<144x72xf32>, vector<12x72xf32> -> vector<12x72xf32>
    %65 = tpu.iota {dimensions = array<i32: 0>} : vector<144x72xi32>
    %66 = tpu.iota {dimensions = array<i32: 1>} : vector<144x72xi32>
    %c2_i32_38 = arith.constant 2 : i32
    %67 = vector.broadcast %c2_i32_38 : i32 to vector<144x72xi32>
    %68 = arith.muli %67, %66 : vector<144x72xi32>
    %c1_i32_39 = arith.constant 1 : i32
    %69 = vector.broadcast %c1_i32_39 : i32 to vector<144x72xi32>
    %70 = arith.addi %68, %69 : vector<144x72xi32>
    %71 = arith.cmpi eq, %65, %70 : vector<144x72xi32>
    %72 = arith.extui %71 : vector<144x72xi1> to vector<144x72xi32>
    %73 = arith.sitofp %72 : vector<144x72xi32> to vector<144x72xf32>
    %cst_40 = arith.constant dense<0.000000e+00> : vector<12x72xf32>
    %74 = tpu.matmul %54, %73, %cst_40 {dimension_numbers = #tpu.dot_dimension_numbers<[1], [0], [0], [1], [0, 0, 1, 1], [], []>} : vector<12x144xf32>, vector<144x72xf32>, vector<12x72xf32> -> vector<12x72xf32>
    %75 = arith.maximumf %64, %74 : vector<12x72xf32>
    %c0_41 = arith.constant 0 : index
    %c0_42 = arith.constant 0 : index
    %76 = vector.load %arg13[%c0_41, %c0_42] : memref<12x72xf32, #tpu.memory_space<vmem>>, vector<12x72xf32>
    tpu.vector_store %arg13[%c0_41, %c0_42], %75 {strides = array<i32>} : memref<12x72xf32, #tpu.memory_space<vmem>>, vector<12x72xf32>,
    %c0_43 = arith.constant 0 : index
    %c0_44 = arith.constant 0 : index
    %77 = vector.load %arg13[%c0_43, %c0_44] : memref<12x72xf32, #tpu.memory_space<vmem>>, vector<8x72xf32>
    %c0_45 = arith.constant 0 : index
    %c0_46 = arith.constant 0 : index
    %c0_47 = arith.constant 0 : index
    %78 = vector.load %arg4[%c0_45, %c0_46, %c0_47] : memref<5x72x128xf32, #tpu.memory_space<vmem>>, vector<1x72x128xf32>
    %79 = vector.shape_cast %78 : vector<1x72x128xf32> to vector<72x128xf32>
    %cst_48 = arith.constant dense<0.000000e+00> : vector<8x128xf32>
    %80 = tpu.matmul %77, %79, %cst_48 {dimension_numbers = #tpu.dot_dimension_numbers<[1], [0], [0], [1], [0, 0, 1, 1], [], []>} : vector<8x72xf32>, vector<72x128xf32>, vector<8x128xf32> -> vector<8x128xf32>
    %c1_49 = arith.constant 1 : index
    %c0_50 = arith.constant 0 : index
    %81 = vector.load %arg13[%c1_49, %c0_50] : memref<12x72xf32, #tpu.memory_space<vmem>>, vector<8x72xf32>
    %c1_51 = arith.constant 1 : index
    %c0_52 = arith.constant 0 : index
    %c0_53 = arith.constant 0 : index
    %82 = vector.load %arg4[%c1_51, %c0_52, %c0_53] : memref<5x72x128xf32, #tpu.memory_space<vmem>>, vector<1x72x128xf32>
    %83 = vector.shape_cast %82 : vector<1x72x128xf32> to vector<72x128xf32>
    %cst_54 = arith.constant dense<0.000000e+00> : vector<8x128xf32>
    %84 = tpu.matmul %81, %83, %cst_54 {dimension_numbers = #tpu.dot_dimension_numbers<[1], [0], [0], [1], [0, 0, 1, 1], [], []>} : vector<8x72xf32>, vector<72x128xf32>, vector<8x128xf32> -> vector<8x128xf32>
    %85 = arith.addf %80, %84 : vector<8x128xf32>
    %c2_55 = arith.constant 2 : index
    %c0_56 = arith.constant 0 : index
    %86 = vector.load %arg13[%c2_55, %c0_56] : memref<12x72xf32, #tpu.memory_space<vmem>>, vector<8x72xf32>
    %c2_57 = arith.constant 2 : index
    %c0_58 = arith.constant 0 : index
    %c0_59 = arith.constant 0 : index
    %87 = vector.load %arg4[%c2_57, %c0_58, %c0_59] : memref<5x72x128xf32, #tpu.memory_space<vmem>>, vector<1x72x128xf32>
    %88 = vector.shape_cast %87 : vector<1x72x128xf32> to vector<72x128xf32>
    %cst_60 = arith.constant dense<0.000000e+00> : vector<8x128xf32>
    %89 = tpu.matmul %86, %88, %cst_60 {dimension_numbers = #tpu.dot_dimension_numbers<[1], [0], [0], [1], [0, 0, 1, 1], [], []>} : vector<8x72xf32>, vector<72x128xf32>, vector<8x128xf32> -> vector<8x128xf32>
    %90 = arith.addf %85, %89 : vector<8x128xf32>
    %c3_61 = arith.constant 3 : index
    %c0_62 = arith.constant 0 : index
    %91 = vector.load %arg13[%c3_61, %c0_62] : memref<12x72xf32, #tpu.memory_space<vmem>>, vector<8x72xf32>
    %c3_63 = arith.constant 3 : index
    %c0_64 = arith.constant 0 : index
    %c0_65 = arith.constant 0 : index
    %92 = vector.load %arg4[%c3_63, %c0_64, %c0_65] : memref<5x72x128xf32, #tpu.memory_space<vmem>>, vector<1x72x128xf32>
    %93 = vector.shape_cast %92 : vector<1x72x128xf32> to vector<72x128xf32>
    %cst_66 = arith.constant dense<0.000000e+00> : vector<8x128xf32>
    %94 = tpu.matmul %91, %93, %cst_66 {dimension_numbers = #tpu.dot_dimension_numbers<[1], [0], [0], [1], [0, 0, 1, 1], [], []>} : vector<8x72xf32>, vector<72x128xf32>, vector<8x128xf32> -> vector<8x128xf32>
    %95 = arith.addf %90, %94 : vector<8x128xf32>
    %c4_67 = arith.constant 4 : index
    %c0_68 = arith.constant 0 : index
    %96 = vector.load %arg13[%c4_67, %c0_68] : memref<12x72xf32, #tpu.memory_space<vmem>>, vector<8x72xf32>
    %c4_69 = arith.constant 4 : index
    %c0_70 = arith.constant 0 : index
    %c0_71 = arith.constant 0 : index
    %97 = vector.load %arg4[%c4_69, %c0_70, %c0_71] : memref<5x72x128xf32, #tpu.memory_space<vmem>>, vector<1x72x128xf32>
    %98 = vector.shape_cast %97 : vector<1x72x128xf32> to vector<72x128xf32>
    %cst_72 = arith.constant dense<0.000000e+00> : vector<8x128xf32>
    %99 = tpu.matmul %96, %98, %cst_72 {dimension_numbers = #tpu.dot_dimension_numbers<[1], [0], [0], [1], [0, 0, 1, 1], [], []>} : vector<8x72xf32>, vector<72x128xf32>, vector<8x128xf32> -> vector<8x128xf32>
    %100 = arith.addf %95, %99 : vector<8x128xf32>
    %c0_73 = arith.constant 0 : index
    %c0_74 = arith.constant 0 : index
    %101 = vector.load %arg5[%c0_73, %c0_74] : memref<1x128xf32, #tpu.memory_space<vmem>>, vector<1x128xf32>
    %102 = vector.broadcast %101 : vector<1x128xf32> to vector<8x128xf32>
    %103 = arith.addf %100, %102 : vector<8x128xf32>
    %cst_75 = arith.constant 0.000000e+00 : f32
    %104 = vector.broadcast %cst_75 : f32 to vector<8x128xf32>
    %105 = arith.maximumf %103, %104 : vector<8x128xf32>
    %106 = tpu.iota {dimensions = array<i32: 1>} : vector<4x8xi32>
    %107 = tpu.iota {dimensions = array<i32: 0>} : vector<4x8xi32>
    %c2_i32_76 = arith.constant 2 : i32
    %108 = vector.broadcast %c2_i32_76 : i32 to vector<4x8xi32>
    %109 = arith.muli %108, %107 : vector<4x8xi32>
    %c0_i32_77 = arith.constant 0 : i32
    %110 = vector.broadcast %c0_i32_77 : i32 to vector<4x8xi32>
    %111 = arith.addi %109, %110 : vector<4x8xi32>
    %112 = arith.cmpi eq, %106, %111 : vector<4x8xi32>
    %113 = arith.extui %112 : vector<4x8xi1> to vector<4x8xi32>
    %114 = arith.sitofp %113 : vector<4x8xi32> to vector<4x8xf32>
    %cst_78 = arith.constant dense<0.000000e+00> : vector<4x128xf32>
    %115 = tpu.matmul %114, %105, %cst_78 {dimension_numbers = #tpu.dot_dimension_numbers<[1], [0], [0], [1], [0, 0, 1, 1], [], []>} : vector<4x8xf32>, vector<8x128xf32>, vector<4x128xf32> -> vector<4x128xf32>
    %116 = tpu.iota {dimensions = array<i32: 1>} : vector<4x8xi32>
    %117 = tpu.iota {dimensions = array<i32: 0>} : vector<4x8xi32>
    %c2_i32_79 = arith.constant 2 : i32
    %118 = vector.broadcast %c2_i32_79 : i32 to vector<4x8xi32>
    %119 = arith.muli %118, %117 : vector<4x8xi32>
    %c1_i32_80 = arith.constant 1 : i32
    %120 = vector.broadcast %c1_i32_80 : i32 to vector<4x8xi32>
    %121 = arith.addi %119, %120 : vector<4x8xi32>
    %122 = arith.cmpi eq, %116, %121 : vector<4x8xi32>
    %123 = arith.extui %122 : vector<4x8xi1> to vector<4x8xi32>
    %124 = arith.sitofp %123 : vector<4x8xi32> to vector<4x8xf32>
    %cst_81 = arith.constant dense<0.000000e+00> : vector<4x128xf32>
    %125 = tpu.matmul %124, %105, %cst_81 {dimension_numbers = #tpu.dot_dimension_numbers<[1], [0], [0], [1], [0, 0, 1, 1], [], []>} : vector<4x8xf32>, vector<8x128xf32>, vector<4x128xf32> -> vector<4x128xf32>
    %126 = arith.maximumf %115, %125 : vector<4x128xf32>
    %127 = tpu.iota {dimensions = array<i32: 0>} : vector<128x64xi32>
    %128 = tpu.iota {dimensions = array<i32: 1>} : vector<128x64xi32>
    %c2_i32_82 = arith.constant 2 : i32
    %129 = vector.broadcast %c2_i32_82 : i32 to vector<128x64xi32>
    %130 = arith.muli %129, %128 : vector<128x64xi32>
    %c0_i32_83 = arith.constant 0 : i32
    %131 = vector.broadcast %c0_i32_83 : i32 to vector<128x64xi32>
    %132 = arith.addi %130, %131 : vector<128x64xi32>
    %133 = arith.cmpi eq, %127, %132 : vector<128x64xi32>
    %134 = arith.extui %133 : vector<128x64xi1> to vector<128x64xi32>
    %135 = arith.sitofp %134 : vector<128x64xi32> to vector<128x64xf32>
    %cst_84 = arith.constant dense<0.000000e+00> : vector<4x64xf32>
    %136 = tpu.matmul %126, %135, %cst_84 {dimension_numbers = #tpu.dot_dimension_numbers<[1], [0], [0], [1], [0, 0, 1, 1], [], []>} : vector<4x128xf32>, vector<128x64xf32>, vector<4x64xf32> -> vector<4x64xf32>
    %137 = tpu.iota {dimensions = array<i32: 0>} : vector<128x64xi32>
    %138 = tpu.iota {dimensions = array<i32: 1>} : vector<128x64xi32>
    %c2_i32_85 = arith.constant 2 : i32
    %139 = vector.broadcast %c2_i32_85 : i32 to vector<128x64xi32>
    %140 = arith.muli %139, %138 : vector<128x64xi32>
    %c1_i32_86 = arith.constant 1 : i32
    %141 = vector.broadcast %c1_i32_86 : i32 to vector<128x64xi32>
    %142 = arith.addi %140, %141 : vector<128x64xi32>
    %143 = arith.cmpi eq, %137, %142 : vector<128x64xi32>
    %144 = arith.extui %143 : vector<128x64xi1> to vector<128x64xi32>
    %145 = arith.sitofp %144 : vector<128x64xi32> to vector<128x64xf32>
    %cst_87 = arith.constant dense<0.000000e+00> : vector<4x64xf32>
    %146 = tpu.matmul %126, %145, %cst_87 {dimension_numbers = #tpu.dot_dimension_numbers<[1], [0], [0], [1], [0, 0, 1, 1], [], []>} : vector<4x128xf32>, vector<128x64xf32>, vector<4x64xf32> -> vector<4x64xf32>
    %147 = arith.maximumf %136, %146 : vector<4x64xf32>
    %c0_88 = arith.constant 0 : index
    %c0_89 = arith.constant 0 : index
    %148 = vector.load %arg14[%c0_88, %c0_89] : memref<4x64xf32, #tpu.memory_space<vmem>>, vector<4x64xf32>
    tpu.vector_store %arg14[%c0_88, %c0_89], %147 {strides = array<i32>} : memref<4x64xf32, #tpu.memory_space<vmem>>, vector<4x64xf32>,
    %c0_90 = arith.constant 0 : index
    %c0_91 = arith.constant 0 : index
    %149 = vector.load %arg7[%c0_90, %c0_91] : memref<1x128xf32, #tpu.memory_space<vmem>>, vector<1x128xf32>
    %c0_92 = arith.constant 0 : index
    %c0_93 = arith.constant 0 : index
    %150 = vector.load %arg14[%c0_92, %c0_93] : memref<4x64xf32, #tpu.memory_space<vmem>>, vector<1x64xf32>
    %c0_94 = arith.constant 0 : index
    %c0_95 = arith.constant 0 : index
    %c0_96 = arith.constant 0 : index
    %151 = vector.load %arg6[%c0_94, %c0_95, %c0_96] : memref<4x64x128xf32, #tpu.memory_space<vmem>>, vector<1x64x128xf32>
    %152 = vector.shape_cast %151 : vector<1x64x128xf32> to vector<64x128xf32>
    %cst_97 = arith.constant dense<0.000000e+00> : vector<1x128xf32>
    %153 = tpu.matmul %150, %152, %cst_97 {dimension_numbers = #tpu.dot_dimension_numbers<[1], [0], [0], [1], [0, 0, 1, 1], [], []>} : vector<1x64xf32>, vector<64x128xf32>, vector<1x128xf32> -> vector<1x128xf32>
    %154 = arith.addf %149, %153 : vector<1x128xf32>
    %c1_98 = arith.constant 1 : index
    %c0_99 = arith.constant 0 : index
    %155 = vector.load %arg14[%c1_98, %c0_99] : memref<4x64xf32, #tpu.memory_space<vmem>>, vector<1x64xf32>
    %c1_100 = arith.constant 1 : index
    %c0_101 = arith.constant 0 : index
    %c0_102 = arith.constant 0 : index
    %156 = vector.load %arg6[%c1_100, %c0_101, %c0_102] : memref<4x64x128xf32, #tpu.memory_space<vmem>>, vector<1x64x128xf32>
    %157 = vector.shape_cast %156 : vector<1x64x128xf32> to vector<64x128xf32>
    %cst_103 = arith.constant dense<0.000000e+00> : vector<1x128xf32>
    %158 = tpu.matmul %155, %157, %cst_103 {dimension_numbers = #tpu.dot_dimension_numbers<[1], [0], [0], [1], [0, 0, 1, 1], [], []>} : vector<1x64xf32>, vector<64x128xf32>, vector<1x128xf32> -> vector<1x128xf32>
    %159 = arith.addf %154, %158 : vector<1x128xf32>
    %c2_104 = arith.constant 2 : index
    %c0_105 = arith.constant 0 : index
    %160 = vector.load %arg14[%c2_104, %c0_105] : memref<4x64xf32, #tpu.memory_space<vmem>>, vector<1x64xf32>
    %c2_106 = arith.constant 2 : index
    %c0_107 = arith.constant 0 : index
    %c0_108 = arith.constant 0 : index
    %161 = vector.load %arg6[%c2_106, %c0_107, %c0_108] : memref<4x64x128xf32, #tpu.memory_space<vmem>>, vector<1x64x128xf32>
    %162 = vector.shape_cast %161 : vector<1x64x128xf32> to vector<64x128xf32>
    %cst_109 = arith.constant dense<0.000000e+00> : vector<1x128xf32>
    %163 = tpu.matmul %160, %162, %cst_109 {dimension_numbers = #tpu.dot_dimension_numbers<[1], [0], [0], [1], [0, 0, 1, 1], [], []>} : vector<1x64xf32>, vector<64x128xf32>, vector<1x128xf32> -> vector<1x128xf32>
    %164 = arith.addf %159, %163 : vector<1x128xf32>
    %c3_110 = arith.constant 3 : index
    %c0_111 = arith.constant 0 : index
    %165 = vector.load %arg14[%c3_110, %c0_111] : memref<4x64xf32, #tpu.memory_space<vmem>>, vector<1x64xf32>
    %c3_112 = arith.constant 3 : index
    %c0_113 = arith.constant 0 : index
    %c0_114 = arith.constant 0 : index
    %166 = vector.load %arg6[%c3_112, %c0_113, %c0_114] : memref<4x64x128xf32, #tpu.memory_space<vmem>>, vector<1x64x128xf32>
    %167 = vector.shape_cast %166 : vector<1x64x128xf32> to vector<64x128xf32>
    %cst_115 = arith.constant dense<0.000000e+00> : vector<1x128xf32>
    %168 = tpu.matmul %165, %167, %cst_115 {dimension_numbers = #tpu.dot_dimension_numbers<[1], [0], [0], [1], [0, 0, 1, 1], [], []>} : vector<1x64xf32>, vector<64x128xf32>, vector<1x128xf32> -> vector<1x128xf32>
    %169 = arith.addf %164, %168 : vector<1x128xf32>
    %cst_116 = arith.constant 0.000000e+00 : f32
    %170 = vector.broadcast %cst_116 : f32 to vector<1x128xf32>
    %171 = arith.maximumf %169, %170 : vector<1x128xf32>
    %c0_117 = arith.constant 0 : index
    %c0_118 = arith.constant 0 : index
    %172 = vector.load %arg8[%c0_117, %c0_118] : memref<128x128xf32, #tpu.memory_space<vmem>>, vector<128x128xf32>
    %cst_119 = arith.constant dense<0.000000e+00> : vector<1x128xf32>
    %173 = tpu.matmul %171, %172, %cst_119 {dimension_numbers = #tpu.dot_dimension_numbers<[1], [0], [0], [1], [0, 0, 1, 1], [], []>} : vector<1x128xf32>, vector<128x128xf32>, vector<1x128xf32> -> vector<1x128xf32>
    %c0_120 = arith.constant 0 : index
    %c0_121 = arith.constant 0 : index
    %174 = vector.load %arg9[%c0_120, %c0_121] : memref<1x128xf32, #tpu.memory_space<vmem>>, vector<1x128xf32>
    %175 = arith.addf %173, %174 : vector<1x128xf32>
    %cst_122 = arith.constant 0.000000e+00 : f32
    %176 = vector.broadcast %cst_122 : f32 to vector<1x128xf32>
    %177 = arith.maximumf %175, %176 : vector<1x128xf32>
    %c0_123 = arith.constant 0 : index
    %c0_124 = arith.constant 0 : index
    %178 = vector.load %arg10[%c0_123, %c0_124] : memref<128x128xf32, #tpu.memory_space<vmem>>, vector<128x128xf32>
    %cst_125 = arith.constant dense<0.000000e+00> : vector<1x128xf32>
    %179 = tpu.matmul %177, %178, %cst_125 {dimension_numbers = #tpu.dot_dimension_numbers<[1], [0], [0], [1], [0, 0, 1, 1], [], []>} : vector<1x128xf32>, vector<128x128xf32>, vector<1x128xf32> -> vector<1x128xf32>
    %c0_126 = arith.constant 0 : index
    %c0_127 = arith.constant 0 : index
    %180 = vector.load %arg11[%c0_126, %c0_127] : memref<1x128xf32, #tpu.memory_space<vmem>>, vector<1x128xf32>
    %181 = arith.addf %179, %180 : vector<1x128xf32>
    %c0_128 = arith.constant 0 : index
    %c0_129 = arith.constant 0 : index
    %c0_130 = arith.constant 0 : index
    %182 = vector.load %arg12[%c0_128, %c0_129, %c0_130] : memref<1x1x128xf32, #tpu.memory_space<vmem>>, vector<1x1x128xf32>
    %183 = vector.shape_cast %182 : vector<1x1x128xf32> to vector<1x128xf32>
    %184 = vector.shape_cast %181 : vector<1x128xf32> to vector<1x1x128xf32>
    tpu.vector_store %arg12[%c0_128, %c0_129, %c0_130], %184 {strides = array<i32>} : memref<1x1x128xf32, #tpu.memory_space<vmem>>, vector<1x1x128xf32>,
    return
  }
  func.func @transform_0(%arg0: i32) -> (i32, i32, i32) {
    %c0_i32 = arith.constant 0 : i32
    %c0_i32_0 = arith.constant 0 : i32
    %c0_i32_1 = arith.constant 0 : i32
    return %arg0, %c0_i32, %c0_i32_0 : i32, i32, i32
  }
  func.func @transform_1(%arg0: i32) -> (i32, i32, i32) {
    %c0_i32 = arith.constant 0 : i32
    %c0_i32_0 = arith.constant 0 : i32
    %c0_i32_1 = arith.constant 0 : i32
    %c0_i32_2 = arith.constant 0 : i32
    return %c0_i32, %c0_i32_0, %c0_i32_1 : i32, i32, i32
  }
  func.func @transform_2(%arg0: i32) -> (i32, i32) {
    %c0_i32 = arith.constant 0 : i32
    %c0_i32_0 = arith.constant 0 : i32
    %c0_i32_1 = arith.constant 0 : i32
    return %c0_i32, %c0_i32_0 : i32, i32
  }
  func.func @transform_3(%arg0: i32) -> (i32, i32, i32) {
    %c0_i32 = arith.constant 0 : i32
    %c0_i32_0 = arith.constant 0 : i32
    %c0_i32_1 = arith.constant 0 : i32
    %c0_i32_2 = arith.constant 0 : i32
    return %c0_i32, %c0_i32_0, %c0_i32_1 : i32, i32, i32
  }
  func.func @transform_4(%arg0: i32) -> (i32, i32) {
    %c0_i32 = arith.constant 0 : i32
    %c0_i32_0 = arith.constant 0 : i32
    %c0_i32_1 = arith.constant 0 : i32
    return %c0_i32, %c0_i32_0 : i32, i32
  }
  func.func @transform_5(%arg0: i32) -> (i32, i32, i32) {
    %c0_i32 = arith.constant 0 : i32
    %c0_i32_0 = arith.constant 0 : i32
    %c0_i32_1 = arith.constant 0 : i32
    %c0_i32_2 = arith.constant 0 : i32
    return %c0_i32, %c0_i32_0, %c0_i32_1 : i32, i32, i32
  }
  func.func @transform_6(%arg0: i32) -> (i32, i32) {
    %c0_i32 = arith.constant 0 : i32
    %c0_i32_0 = arith.constant 0 : i32
    %c0_i32_1 = arith.constant 0 : i32
    return %c0_i32, %c0_i32_0 : i32, i32
  }
  func.func @transform_7(%arg0: i32) -> (i32, i32) {
    %c0_i32 = arith.constant 0 : i32
    %c0_i32_0 = arith.constant 0 : i32
    %c0_i32_1 = arith.constant 0 : i32
    return %c0_i32, %c0_i32_0 : i32, i32
  }
  func.func @transform_8(%arg0: i32) -> (i32, i32) {
    %c0_i32 = arith.constant 0 : i32
    %c0_i32_0 = arith.constant 0 : i32
    %c0_i32_1 = arith.constant 0 : i32
    return %c0_i32, %c0_i32_0 : i32, i32
  }
  func.func @transform_9(%arg0: i32) -> (i32, i32) {
    %c0_i32 = arith.constant 0 : i32
    %c0_i32_0 = arith.constant 0 : i32
    %c0_i32_1 = arith.constant 0 : i32
    return %c0_i32, %c0_i32_0 : i32, i32
  }
  func.func @transform_10(%arg0: i32) -> (i32, i32) {
    %c0_i32 = arith.constant 0 : i32
    %c0_i32_0 = arith.constant 0 : i32
    %c0_i32_1 = arith.constant 0 : i32
    return %c0_i32, %c0_i32_0 : i32, i32
  }
  func.func @transform_11(%arg0: i32) -> (i32, i32, i32) {
    %c0_i32 = arith.constant 0 : i32
    %c0_i32_0 = arith.constant 0 : i32
    %c0_i32_1 = arith.constant 0 : i32
    return %arg0, %c0_i32, %c0_i32_0 : i32, i32, i32
  }
}

</mosaic_0001>

<bundles_post_ra>
// kernel: net_forward.1
= control target key start
LH: loop header
LB: loop body
LE: loop exit
PB: predicated region body
PF: predicated region fallthrough
CT: control target
= control target key end

     0   :  { %s3080_s0 = inlined_call_operand.vmem [shape: f32[2,28,28], index: 0, kind: input, shape index: {}]   ;;  %s3081_s1 = inlined_call_operand.hbm [shape: f32[5,28,144], index: 1, kind: input, shape index: {}]   ;;  %s3082_s2 = inlined_call_operand.vmem [shape: f32[1,144], index: 2, kind: input, shape index: {}]   ;;  %s3083_s3 = inlined_call_operand.hbm [shape: f32[5,72,128], index: 3, kind: input, shape index: {}]   ;;  %s3084_s4 = inlined_call_operand.vmem [shape: f32[1,128], index: 4, kind: input, shape index: {}]   ;;  %s3085_s5 = inlined_call_operand.hbm [shape: f32[4,64,128], index: 5, kind: input, shape index: {}]   ;;  %s3086_s6 = inlined_call_operand.vmem [shape: f32[1,128], index: 6, kind: input, shape index: {}]   ;;  %s3087_s7 = inlined_call_operand.vmem [shape: f32[128,128], index: 7, kind: input, shape index: {}]   ;;  %s3088_s8 = inlined_call_operand.vmem [shape: f32[1,128], index: 8, kind: input, shape index: {}]   ;;  %s3089_s9 = inlined_call_operand.hbm [shape: f32[128,128], index: 9, kind: input, shape index: {}]   ;;  %s3090_s10 = inlined_call_operand.vmem [shape: f32[1,128], index: 10, kind: input, shape index: {}]   ;;  %s3091_s11 = inlined_call_operand.hbm [shape: f32[2,1,128], index: 11, kind: output, shape index: {}]  }
   0x1   :  { %3118 = sst [smem:[#allocation23_spill]] %s3081_s1 }
   0x2   :  { %3119 = sst [smem:[#allocation24_spill]] %s3083_s3 }
   0x3   :  { %16 = vsyncpa [#allocation5], 0 }
   0x4   :  { %17 = vsyncpa [#allocation8], 0 }
   0x5   :  { %18 = vsyncpa [#allocation11], 0 }
   0x6   :  { %19 = vsyncpa [#allocation6], 0 }
   0x7   :  { %21 = vsyncpa [#allocation6 + $0x1], 0  ;;  %s2383_s17 = smov 0   ;;  %s2385_s18 = smov 0  }
   0x8   :  { %s2387_s19 = smov 0   ;;  %s2389_s20 = smov 0  }
   0x9 LB: > { %3120 = sst [smem:[#allocation17_spill]] %s2299_s17  ;;  %s2404_s21 = sadd.s32 4294967295, %s2311_s20   ;;  %s2311_s20 = sphi %s2389_s20, %s3155_s20   ;;  %s2307_s19 = sphi %s2387_s19, %s3157_s19   ;;  %s2303_s18 = sphi %s2385_s18, %s3159_s18   ;;  %s2299_s17 = sphi %s2383_s17, %s3158_s17  }
   0xa   : > { %3121 = sst [smem:[#allocation18_spill]] %s2307_s19  ;;  %s1834_s22 = sadd.s32 4294967294, %s2311_s20  }
   0xb   : > { %3122 = sst [smem:[#allocation19_spill]] %s2311_s20  ;;  %s2408_s23 = sadd.s32 1, %s2311_s20  }
   0xc   : > { %3123 = sst [smem:[#allocation20_spill]] %s2408_s23  ;;  %s270_s24 = sadd.s32 1, %s2307_s19 }
   0xd   : > { %s267_s25 = ssub.s32 %s2311_s20, %s2408_s23  ;;  %p280_p0 = scmp.ne.s32.totalorder %s2307_s19, %s2303_s18 }
   0xe   : > { %p268_p1 = scmp.eq.s32.totalorder %s267_s25, 0  ;;  %p281_p2 = scmp.eq.s32.totalorder %s2404_s21, 1 }
   0xf   : > { %p286_p3 = scmp.ne.s32.totalorder %s2303_s18, %s2299_s17  ;;  %p287_p4 = scmp.eq.s32.totalorder %s1834_s22, 1 }
  0x10   : > { %s2419_s26 = scalar_select %p268_p1, %s2307_s19, %s270_s24  }
  0x11   : > { %p2421_p5 = por %p281_p2, %p280_p0  ;;  %p2425_p6 = por %p287_p4, %p286_p3 }
  0x12   : > { %3124 = sst [smem:[#allocation21_spill]] %s2419_s26  ;;  %p1835_p7 = scmp.ge.s32.totalorder %s2311_s20, 1 }
  0x13   : > { %s3126_s28 = scalar_select %p2425_p6, 1, 0 }
  0x14   : > { %p294_p8 = scmp.lt.s32.totalorder %s2311_s20, 3  ;;  %p2065_p9 = scmp.eq.s32.totalorder %s2404_s21, 0 }
  0x15   : > { %3127 = sst [smem:[#allocation22_spill]] %s3126_s28  ;;  %s2313_s14 = smov [#allocation7]  }
  0x16   : > { %p2432_p10 = pnand %p1835_p7, %p294_p8  ;;  %s3129_s3 = sld [smem:[#allocation24_spill]] }
  0x17   : > { %s324_s15 = sshll.u32 %s2313_s14, 4  ;;  %s3131_s1 = sld [smem:[#allocation23_spill]]  ;;  %s325_s15 = int_to_ptr.vmem [resolvable:$true] %s324_s15 }
  0x18   : > { %p2048_p11 = pneg %p2432_p10  ;;  %s2314_s30 = smov 128  }
  0x19   : > { %s2315_s12 = smov 8   ;;  %s2317_s26 = smov 256  }
  0x1a   : > { %p2443_p12 = pnand %p2065_p9, %p2048_p11  ;;  %s2318_s19 = smov 16  }
  0x1b   : > { %s339_s22 = sshll.u32 %s3085_s5, 4  ;;  %s2319_s24 = smov [#allocation9]   ;;  %s340_s22 = int_to_ptr.hbm [resolvable:$true] %s339_s22 }
  0x1c   : > { %s322_s13 = sshll.u32 %s3129_s3, 4  ;;  %s2316_s3 = smov [#allocation4]   ;;  %s323_s13 = int_to_ptr.hbm [resolvable:$true] %s322_s13 }
  0x1d   : > { %s305_s25 = sshll.u32 %s3131_s1, 4  ;;  %s307_s14 = sshll.u32 %s2316_s3, 4  ;;  %s306_s25 = int_to_ptr.hbm [resolvable:$true] %s305_s25  ;;  %s308_s14 = int_to_ptr.vmem [resolvable:$true] %s307_s14 }
  0x1e   : > { %2054 = dma.hbm_to_vmem [thread:$0]  (!%p2443_p12), %s323_s13, 5760, %s325_s15, [#allocation8], %s2314_s30, %s2314_s30, %s2315_s12  }
  0x1f   : > { %2051 = dma.hbm_to_vmem [thread:$0]  (!%p2443_p12), %s306_s25, 5120, %s308_s14, [#allocation5], %s2317_s26, %s2317_s26, %s2318_s19  }
  0x20   : > { %s341_s1 = sshll.u32 %s2319_s24, 4  ;;  %s362_s13 = sshll.u32 %s3089_s9, 4  ;;  %s342_s1 = int_to_ptr.vmem [resolvable:$true] %s341_s1  ;;  %s363_s13 = int_to_ptr.hbm [resolvable:$true] %s362_s13 }
  0x21   : > { %2057 = dma.hbm_to_vmem [thread:$0]  (!%p2443_p12), %s340_s22, 4096, %s342_s1, [#allocation8], %s2314_s30, %s2314_s30, %s2315_s12  }
  0x22   : > { %s2320_s3 = smov [#allocation10]   ;;  %391 = sbr.rel (%p2432_p10) target bundleno = 1403 (0x57b), region = 64 }
  0x23   : > { %s364_s15 = sshll.u32 %s2320_s3, 4  ;;  %s365_s15 = int_to_ptr.vmem [resolvable:$true] %s364_s15 }
  0x24   : > { %2060 = dma.hbm_to_vmem [thread:$0]  (!%p2443_p12), %s363_s13, 2048, %s365_s15, [#allocation11], %s2314_s30, %s2314_s30, %s2315_s12  }
  0x27   : > { %2282 = dma.done.wait (%p2065_p9), [#allocation5], 5120  }
  0x28   : > { %2284 = vsyncadd (%p2065_p9), [#allocation5], 4294962176 }
  0x29   : > { %2286 = dma.done.wait (%p2065_p9), [#allocation8], 9856  }
  0x2a   : > { %2288 = vsyncadd (%p2065_p9), [#allocation8], 4294957440 }
  0x2b   : > { %2290 = dma.done.wait (%p2065_p9), [#allocation11], 2048  }
  0x2c   : > { %2292 = vsyncadd (%p2065_p9), [#allocation11], 4294965248  ;;  %p446_p13 = scmp.lt.s32.totalorder %s2404_s21, 1  ;;  %vm484_vm0 = vcmask 1043456   ;;  %v472_v0 = vld [vmem:[#allocation4 + $0x70] sm:$0xf]  ;;  %s1734_s14 = scalar_lea.hbm %s3091_s11, %s2404_s21 }
  0x2d   : > { %v460_v1 = vld [vmem:[#allocation4 + $0x30] sm:$0xf]  ;;  %v470_v2 = vld [vmem:[#allocation4 + $0x60] sm:$0xff]  ;;  %1848 = vmatpush.msk.msra.mxu0 %vm484_vm0, %v472_v0  ;;  %2022 = vmatpush.msk.msra.mxu1 %vm484_vm0, %v472_v0  ;;  %vm474_vm1 = vcmask 228352   ;;  %v473_v12 = vld [vmem:[#allocation4 + $0x78] sm:$0xf] }
  0x2e   : > { %s447_s1 = scalar_select %p446_p13, %s2404_s21, 1  ;;  %v458_v3 = vld [vmem:[#allocation4 + $0x20] sm:$0xff]  ;;  %1856 = vmatpush.msk.msra.mxu2 %vm484_vm0, %v460_v1  ;;  %v468_v4 = vld [vmem:[#allocation4 + $0x50] sm:$0xff]  ;;  %v461_v13 = vld [vmem:[#allocation4 + $0x38] sm:$0xf]  ;;  %vm896_vm3 = vcmask 195584  }
  0x2f   : > { %504 = vmatpush.msra.mxu0 %v470_v2  ;;  %2023 = vmatpush.msra.mxu1 %v470_v2  ;;  %v456_v5 = vld [vmem:[#allocation4 + $0x10] sm:$0xff]  ;;  %v466_v6 = vld [vmem:[#allocation4 + $0x40] sm:$0xff]  ;;  %v471_v15 = vld [vmem:[#allocation4 + $0x68] sm:$0xff]  ;;  %s444_s25 = sand.u32 1, %s2303_s18   ;;  %s1738_s15 = sshll.u32 %s1734_s14, 4  ;;  %s1739_s15 = int_to_ptr.hbm [resolvable:$true] %s1738_s15 }
  0x30   : > { %s2021_s17 = sshll.u32 %s447_s1, 5  ;;  %571 = vmatpush.msra.mxu2 %v458_v3  ;;  %v454_v7 = vld [vmem:[#allocation4] sm:$0xff]  ;;  %v620_v11 = vld [vmem:[#allocation4 + $0xb0] sm:$0xf]  ;;  %v459_v16 = vld [vmem:[#allocation4 + $0x28] sm:$0xff]  ;;  %2026 = vmatpush.msk.msra.mxu3 %vm484_vm0, %v461_v13  ;;  %s445_s13 = scalar_lea.vmem [#allocation12], %s444_s25 }
  0x31   : > { %s2486_s23 = scalar_lea.vmem %s3080_s0, %s2021_s17  ;;  %505 = vmatpush.msra.mxu0 %v468_v4  ;;  %2024 = vmatpush.msra.mxu1 %v468_v4  ;;  %v618_v14 = vld [vmem:[#allocation4 + $0xa0] sm:$0xff]  ;;  %v616_v17 = vld [vmem:[#allocation4 + $0x90] sm:$0xff]  ;;  %v469_v18 = vld [vmem:[#allocation4 + $0x58] sm:$0xff]  ;;  %s1736_s3 = sshll.u32 %s445_s13, 4  ;;  %s1737_s3 = int_to_ptr.vmem [resolvable:$true] %s1736_s3 }
  0x32   : > { %v2489_v8 = vld [vmem:[%s2486_s23 + $0x1] sm:$0xff]  ;;  %572 = vmatpush.msra.mxu2 %v456_v5  ;;  %v2492_v9 = vld [vmem:[%s2486_s23 + $0x9] sm:$0xff]  ;;  %v614_v20 = vld [vmem:[#allocation4 + $0x80] sm:$0xff]  ;;  %2027 = vmatpush.msra.mxu3 %v459_v16  ;;  %s1726_s1 = scalar_lea.sflag [#allocation6], %s444_s25  ;;  %s2251_s17 = sshra.s32 %s1739_s15, 4  ;;  %s2252_s17 = int_to_ptr.hbm [resolvable:$true] %s2251_s17 }
  0x33   : > { %v2495_v10 = vld [vmem:[%s2486_s23] sm:$0xff]  ;;  %506 = vmatpush.msra.mxu0 %v466_v6  ;;  %2025 = vmatpush.msra.mxu1 %v466_v6  ;;  %v457_v19 = vld [vmem:[#allocation4 + $0x18] sm:$0xff]  ;;  %v703_v31 = vld [vmem:[#allocation4 + $0xe0] sm:$0xff]  ;;  %s2253_s19 = scalar_lea.hbm %s2252_s17, 1  ;;  %p2258_p3 = scmp.lt.s32.totalorder %s2252_s17, %s3091_s11 }
  0x34   : > { %573 = vmatpush.msra.mxu2 %v454_v7  ;;  %1849 = vmatmul.msk.f32.vlgmr.msra.gmra.mxu0 %vm474_vm1, %v2489_v8  ;;  %v467_v21 = vld [vmem:[#allocation4 + $0x48] sm:$0xff]  ;;  %v2508_v22 = vld [vmem:[%s2486_s23 + $0x11] sm:$0xff]  ;;  %v2511_v23 = vld [vmem:[%s2486_s23 + $0x8] sm:$0xff]  ;;  %p2254_p0 = scmp.ne.s32.totalorder %s2252_s17, %s2253_s19 }
  0x35   : > { %1850 = vmatmul.msk.f32.vlgmr.msra.gmra.mxu1 %vm474_vm1, %v2492_v9  ;;  %1857 = vmatmul.msk.f32.vlgmr.msra.gmra.mxu2 %vm474_vm1, %v2495_v10  ;;  %v2514_v24 = vld [vmem:[%s2486_s23 + $0x2] sm:$0xff]  ;;  %v621_v26 = vld [vmem:[#allocation4 + $0xb8] sm:$0xf]  ;;  %v453_v30 = vld [vmem:[%s2486_s23 + $0x10] sm:$0xff] }
  0x36   : > { %1864 = vmatpush.msk.msrb.mxu0 %vm484_vm0, %v620_v11  ;;  %1852 = vmatpush.msk.msrb.mxu1 %vm484_vm0, %v473_v12  ;;  %v455_v25 = vld [vmem:[#allocation4 + $0x8] sm:$0xff]  ;;  %v705_v27 = vld [vmem:[#allocation4 + $0xf0] sm:$0xf]  ;;  %v706_v28 = vld [vmem:[#allocation4 + $0xf8] sm:$0xf]  ;;  %p2255_p1 = pnand %p2254_p0, %p2421_p5 }
  0x37   : > { %1860 = vmatpush.msk.msrb.mxu2 %vm484_vm0, %v461_v13  ;;  %2028 = vmatpush.msra.mxu3 %v457_v19  ;;  %v619_v29 = vld [vmem:[#allocation4 + $0xa8] sm:$0xff]  ;;  %v790_v32 = vld [vmem:[#allocation4 + $0x130] sm:$0xf]  ;;  %v617_v34 = vld [vmem:[#allocation4 + $0x98] sm:$0xff] }
  0x38   : > { %650 = vmatpush.msrb.mxu0 %v618_v14  ;;  %530 = vmatpush.msrb.mxu1 %v471_v15  ;;  %v704_v33 = vld [vmem:[#allocation4 + $0xe8] sm:$0xff]  ;;  %v701_v35 = vld [vmem:[#allocation4 + $0xd0] sm:$0xff]  ;;  %v788_v36 = vld [vmem:[#allocation4 + $0x120] sm:$0xff]  ;;  %p2256_p2 = pneg %p2255_p1 }
  0x39   : > { %597 = vmatpush.msrb.mxu2 %v459_v16  ;;  %2029 = vmatpush.msra.mxu3 %v455_v25  ;;  %v611_v37 = vld [vmem:[%s2486_s23 + $0xa] sm:$0xff]  ;;  %v615_v39 = vld [vmem:[#allocation4 + $0x88] sm:$0xff]  ;;  %v699_v40 = vld [vmem:[#allocation4 + $0xc0] sm:$0xff] }
  0x3a   : > { %651 = vmatpush.msrb.mxu0 %v616_v17  ;;  %531 = vmatpush.msrb.mxu1 %v469_v18  ;;  %v702_v38 = vld [vmem:[#allocation4 + $0xd8] sm:$0xff]  ;;  %v700_v41 = vld [vmem:[#allocation4 + $0xc8] sm:$0xff]  ;;  %v786_v42 = vld [vmem:[#allocation4 + $0x110] sm:$0xff] }
  0x3b   : > { %598 = vmatpush.msrb.mxu2 %v457_v19  ;;  %1863 = vmatmul.msk.f32.vlgmr.msra.gmra.mxu3 %vm474_vm1, %v453_v30  ;;  %v695_v43 = vld [vmem:[%s2486_s23 + $0x3] sm:$0xff]  ;;  %v784_v44 = vld [vmem:[#allocation4 + $0x100] sm:$0xff]  ;;  %v791_v46 = vld [vmem:[#allocation4 + $0x138] sm:$0xf] }
  0x3c   : > { %652 = vmatpush.msrb.mxu0 %v614_v20  ;;  %532 = vmatpush.msrb.mxu1 %v467_v21  ;;  %v612_v45 = vld [vmem:[%s2486_s23 + $0x12] sm:$0xff]  ;;  %v789_v47 = vld [vmem:[#allocation4 + $0x128] sm:$0xff]  ;;  %v780_v51 = vld [vmem:[%s2486_s23 + $0x4] sm:$0xff]  ;;  %v883_v20 = vlaneseq }
  0x3d   : > { %1851 = vmatmul.msk.f32.gmra.mxu1 %vm474_vm1, %v2508_v22  ;;  %1858 = vmatmul.msk.f32.gmra.mxu2 %vm474_vm1, %v2511_v23  ;;  %v696_v48 = vld [vmem:[%s2486_s23 + $0xb] sm:$0xff]  ;;  %v785_v50 = vld [vmem:[#allocation4 + $0x108] sm:$0xff]  ;;  %v697_v52 = vld [vmem:[%s2486_s23 + $0x13] sm:$0xff] }
  0x3e   : > { %1865 = vmatmul.msk.f32.vlgmr.msrb.gmra.mxu0 %vm474_vm1, %v2514_v24  ;;  %599 = vmatpush.msrb.mxu2 %v455_v25  ;;  %v787_v49 = vld [vmem:[#allocation4 + $0x118] sm:$0xff]  ;;  %v782_v54 = vld [vmem:[%s2486_s23 + $0x14] sm:$0xff] }
  0x3f   : > { %1868 = vmatpush.msk.msra.mxu1 %vm484_vm0, %v621_v26  ;;  %1876 = vmatpush.msk.msrb.mxu3 %vm484_vm0, %v706_v28  ;;  %v781_v53 = vld [vmem:[%s2486_s23 + $0xc] sm:$0xff]  ;;  %v2569_v28 = vshrl.u32 %v883_v20, 7  ;;  %s2257_s23 = scalar_lea.hbm %s3091_s11, 2 }
  0x40   : > { %1872 = vmatpush.msk.msra.mxu2 %vm484_vm0, %v705_v27  ;;  %1880 = vmatpush.msk.msra.mxu0 %vm484_vm0, %v790_v32  ;;  %p2259_p4 = scmp.lt.s32.totalorder %s2257_s23, %s2253_s19 }
  0x41   : > { %676 = vmatpush.msra.mxu1 %v619_v29  ;;  %761 = vmatpush.msrb.mxu3 %v704_v33 }
  0x42   : > { %735 = vmatpush.msra.mxu2 %v703_v31  ;;  %820 = vmatpush.msra.mxu0 %v788_v36  ;;  %v2571_v36 = vand.u32 127, %v883_v20  ;;  %v2721_v20 = vadd.s32 56, %v2569_v28  ;;  %p2260_p7 = por %p2259_p4, %p2258_p3 }
  0x43   : > { %677 = vmatpush.msra.mxu1 %v617_v34  ;;  %762 = vmatpush.msrb.mxu3 %v702_v38 }
  0x44   : > { %736 = vmatpush.msra.mxu2 %v701_v35  ;;  %821 = vmatpush.msra.mxu0 %v786_v42  ;;  %v2576_v42 = vadd.s32 8, %v2569_v28  ;;  %p2261_p8 = pnand %p2260_p7, %p2256_p2 }
  0x45   : > { %1853 = vmatmul.msk.f32.vlgmr.msrb.gmra.mxu1 %vm474_vm1, %v2489_v8  ;;  %1859 = vmatmul.msk.f32.gmra.mxu2 %vm474_vm1, %v453_v30 }
  0x46   : > { %1866 = vmatmul.msk.f32.gmra.mxu0 %vm474_vm1, %v611_v37  ;;  %678 = vmatpush.msra.mxu1 %v615_v39 }
  0x47   : > { %737 = vmatpush.msra.mxu2 %v699_v40  ;;  %763 = vmatpush.msrb.mxu3 %v700_v41 }
  0x48   : > { %1877 = vmatmul.msk.f32.vlgmr.msrb.gmra.mxu3 %vm474_vm1, %v695_v43  ;;  %822 = vmatpush.msra.mxu0 %v784_v44 }
  0x49   : > { %1884 = vmatpush.msk.msrb.mxu1 %vm484_vm0, %v791_v46 }
  0x4b   : > { %846 = vmatpush.msrb.mxu1 %v789_v47 }
  0x4d   : > { %1854 = vmatmul.msk.f32.gmra.mxu1 %vm474_vm1, %v2492_v9  ;;  %1861 = vmatmul.msk.f32.vlgmr.msrb.gmra.mxu2 %vm474_vm1, %v2495_v10 }
  0x4e   : > { %1867 = vmatmul.msk.f32.gmra.mxu0 %vm474_vm1, %v612_v45  ;;  %847 = vmatpush.msrb.mxu1 %v787_v49 }
  0x50   : > { %1878 = vmatmul.msk.f32.gmra.mxu3 %vm474_vm1, %v696_v48  ;;  %848 = vmatpush.msrb.mxu1 %v785_v50 }
  0x55   : > { %1855 = vmatmul.msk.f32.gmra.mxu1 %vm474_vm1, %v2508_v22  ;;  %1862 = vmatmul.msk.f32.gmra.mxu2 %vm474_vm1, %v2511_v23  ;;  %v865_v23 = vld [vmem:[%s3082_s2] sm:$0x3] }
  0x56   : > { %1881 = vmatmul.msk.f32.vlgmr.msra.gmra.mxu0 %vm474_vm1, %v780_v51  ;;  %v867_v31 = vperm.slane %v865_v23, 0 }
  0x58   : > { %1879 = vmatmul.msk.f32.gmra.mxu3 %vm474_vm1, %v697_v52 }
  0x5d   : > { %1869 = vmatmul.msk.f32.vlgmr.msra.gmra.mxu1 %vm474_vm1, %v2514_v24  ;;  %1873 = vmatmul.msk.f32.vlgmr.msra.gmra.mxu2 %vm474_vm1, %v695_v43 }
  0x5e   : > { %1882 = vmatmul.msk.f32.gmra.mxu0 %vm474_vm1, %v781_v53 }
  0x65   : > { %1870 = vmatmul.msk.f32.gmra.mxu1 %vm474_vm1, %v611_v37  ;;  %1874 = vmatmul.msk.f32.gmra.mxu2 %vm474_vm1, %v696_v48  ;;  %v888_v37 = vmul.u32 2, %v2569_v28  ;;  %v2321_v48 = vmov 0.0  }
  0x66   : > { %1883 = vmatmul.msk.f32.gmra.mxu0 %vm474_vm1, %v782_v54 }
  0x67   : > { %vm890_vm2 = vcmp.eq.s32.totalorder %v2571_v36, %v888_v37 }
  0x68   : > { %v2579_v49 = vsel %vm890_vm2, 1.0, %v2321_v48 }
  0x6d   : > { %1871 = vmatmul.msk.f32.gmra.mxu1 %vm474_vm1, %v612_v45  ;;  %1875 = vmatmul.msk.f32.gmra.mxu2 %vm474_vm1, %v697_v52  ;;  %v889_v52 = vmul.u32 2, %v2576_v42 }
  0x6f   : > { %vm891_vm4 = vcmp.eq.s32.totalorder %v2571_v36, %v889_v52 }
  0x75   : > { %1885 = vmatmul.msk.f32.vlgmr.msrb.gmra.mxu1 %vm474_vm1, %v780_v51 }
  0x7d   : > { %1886 = vmatmul.msk.f32.gmra.mxu1 %vm474_vm1, %v781_v53 }
  0x85   : > { %1887 = vmatmul.msk.f32.gmra.mxu1 %vm474_vm1, %v782_v54 }
  0xb1   : > { %v508_v56 = vpop.f32.mrf.mxu0 }
  0xb2   : > { %v511_v55 = vpop.f32.mrf.mxu1 }
  0xb8   : > { %v575_v57 = vpop.f32.mrf.mxu2 }
  0xb9   : > { %v576_v13 = vadd.f32 %v575_v57, %v508_v56 }
  0xba   : > { %v514_v58 = vpop.f32.mrf.mxu1 }
  0xbb   : > { %v654_v59 = vpop.f32.mrf.mxu0 }
  0xbc   : > { %v689_v18 = vadd.f32 %v654_v59, %v576_v13  ;;  %v2586_v59 = vmul.u32 2, %v2571_v36  ;;  %v2631_v13 = vadd.s32 88, %v2569_v28 }
  0xbe   : > { %v607_v8 = vpop.f32.mrf.mxu3  ;;  %vm1041_vm14 = vcmp.eq.s32.totalorder %v2631_v13, %v2586_v59 }
  0xc0   : > { %v578_v60 = vpop.f32.mrf.mxu2 }
  0xc1   : > { %v579_v11 = vadd.f32 %v578_v60, %v511_v55 }
  0xc2   : > { %v534_v61 = vpop.f32.mrf.mxu1 }
  0xc3   : > { %v657_v63 = vpop.f32.mrf.mxu0 }
  0xc4   : > { %v691_v16 = vadd.f32 %v657_v63, %v579_v11  ;;  %v1889_v63 = vsel %vm891_vm4, 1.0, %v2321_v48  ;;  %v2616_v11 = vadd.s32 96, %v2569_v28 }
  0xc6   : > { %vm1042_vm12 = vcmp.eq.s32.totalorder %v2616_v11, %v2586_v59 }
  0xc8   : > { %v581_v62 = vpop.f32.mrf.mxu2 }
  0xc9   : > { %v582_v17 = vadd.f32 %v581_v62, %v514_v58 }
  0xca   : > { %v537_v0 = vpop.f32.mrf.mxu1 }
  0xcb   : > { %v660_v3 = vpop.f32.mrf.mxu0  ;;  %v765_v14 = vpop.f32.mrf.mxu3 }
  0xcc   : > { %v693_v21 = vadd.f32 %v660_v3, %v582_v17  ;;  %v2590_v3 = vadd.s32 120, %v2569_v28 }
  0xce   : > { %vm1045_vm5 = vcmp.eq.s32.totalorder %v2590_v3, %v2586_v59 }
  0xd0   : > { %v601_v1 = vpop.f32.mrf.mxu2 }
  0xd1   : > { %v602_v44 = vadd.f32 %v601_v1, %v534_v61  ;;  %v868_v61 = vperm.slane %v865_v23, 1  ;;  %v2766_v23 = vadd.s32 32, %v2569_v28 }
  0xd2   : > { %v540_v2 = vpop.f32.mrf.mxu1 }
  0xd3   : > { %v824_v6 = vpop.f32.mrf.mxu0  ;;  %v768_v33 = vpop.f32.mrf.mxu3  ;;  %v608_v45 = vadd.f32 %v607_v8, %v540_v2  ;;  %v949_v2 = vadd.s32 1, %v888_v37  ;;  %v2600_v8 = vadd.s32 104, %v2569_v28 }
  0xd5   : > { %vm951_vm8 = vcmp.eq.s32.totalorder %v2571_v36, %v949_v2  ;;  %vm1043_vm10 = vcmp.eq.s32.totalorder %v2600_v8, %v2586_v59  ;;  %v1318_v2 = vld [vmem:[#allocation7 + $0xb8] sm:$0xff] }
  0xd8   : > { %v604_v4 = vpop.f32.mrf.mxu2 }
  0xd9   : > { %v605_v40 = vadd.f32 %v604_v4, %v537_v0  ;;  %v2593_v4 = vadd.s32 1, %v2586_v59 }
  0xda   : > { %v680_v5 = vpop.f32.mrf.mxu1 }
  0xdb   : > { %v827_v10 = vpop.f32.mrf.mxu0  ;;  %v690_v50 = vadd.f32 %v680_v5, %v602_v44  ;;  %v771_v53 = vpop.f32.mrf.mxu3  ;;  %v2596_v5 = vadd.s32 112, %v2569_v28  ;;  %vm1153_vm6 = vcmp.eq.s32.totalorder %v2590_v3, %v2593_v4  ;;  %vm1151_vm11 = vcmp.eq.s32.totalorder %v2600_v8, %v2593_v4  ;;  %v1263_v44 = vld [vmem:[#allocation7 + $0x80] sm:$0xff]  ;;  %v1554_v3 = vld [vmem:[#allocation9 + $0x70] sm:$0xff] }
  0xdc   : > { %vm1150_vm13 = vcmp.eq.s32.totalorder %v2616_v11, %v2593_v4  ;;  %vm1149_vm15 = vcmp.eq.s32.totalorder %v2631_v13, %v2593_v4  ;;  %v1519_v8 = vld [vmem:[#allocation9 + $0x30] sm:$0xff]  ;;  %v1553_v11 = vld [vmem:[#allocation9 + $0x68] sm:$0xff] }
  0xdd   : > { %v775_v55 = vadd.f32 %v765_v14, %v690_v50  ;;  %vm1044_vm7 = vcmp.eq.s32.totalorder %v2596_v5, %v2586_v59  ;;  %vm1152_vm9 = vcmp.eq.s32.totalorder %v2596_v5, %v2593_v4  ;;  %v2634_v14 = vsel %vm951_vm8, 1.0, %v2321_v48  ;;  %v1250_v50 = vld [vmem:[#allocation7 + $0x28] sm:$0xff]  ;;  %v1520_v5 = vld [vmem:[#allocation9 + $0x38] sm:$0xff]  ;;  %v1518_v13 = vld [vmem:[#allocation9 + $0x28] sm:$0xff] }
  0xe0   : > { %v739_v7 = vpop.f32.mrf.mxu2 }
  0xe1   : > { %v774_v22 = vadd.f32 %v739_v7, %v689_v18  ;;  %v2699_v18 = vadd.s32 72, %v2569_v28 }
  0xe2   : > { %v683_v9 = vpop.f32.mrf.mxu1 }
  0xe3   : > { %v830_v25 = vpop.f32.mrf.mxu0  ;;  %v859_v30 = vadd.f32 %v824_v6, %v774_v22  ;;  %v692_v46 = vadd.f32 %v683_v9, %v605_v40  ;;  %vm3098_vm4 = vcmp.eq.s32.totalorder %v2699_v18, %v2586_v59  ;;  %vm3099_vm8 = vcmp.eq.s32.totalorder %v2699_v18, %v2593_v4 }
  0xe4   : > { %v2751_v22 = vadd.s32 40, %v2569_v28 }
  0xe5   : > { %v871_v38 = vadd.f32 %v867_v31, %v859_v30  ;;  %v777_v54 = vadd.f32 %v768_v33, %v692_v46  ;;  %v1262_v46 = vld [vmem:[#allocation7 + $0x78] sm:$0xff] }
  0xe7   : > { %v877_v47 = vmax.f32 %v871_v38, 0.0 }
  0xe8   : > { %v742_v12 = vpop.f32.mrf.mxu2 }
  0xe9   : > { %v776_v19 = vadd.f32 %v742_v12, %v691_v16  ;;  %v2649_v16 = vadd.s32 80, %v2569_v28 }
  0xea   : > { %v686_v15 = vpop.f32.mrf.mxu1 }
  0xeb   : > { %v861_v26 = vadd.f32 %v827_v10, %v776_v19  ;;  %v694_v51 = vadd.f32 %v686_v15, %v608_v45  ;;  %v2322_v10 = vmov 1.0   ;;  %v950_v15 = vadd.s32 1, %v889_v52  ;;  %v1252_v45 = vld [vmem:[#allocation7 + $0x38] sm:$0xff]  ;;  %v1249_v52 = vld [vmem:[#allocation7 + $0x20] sm:$0xff] }
  0xec   : > { %1918 = vmatpush.msk.msrb.mxu0 %vm1045_vm5, %v2322_v10  ;;  %vm3117_vm1 = vcmp.eq.s32.totalorder %v2649_v16, %v2586_v59  ;;  %vm1148_vm2 = vcmp.eq.s32.totalorder %v2649_v16, %v2593_v4  ;;  %v2706_v19 = vadd.s32 64, %v2569_v28 }
  0xed   : > { %v873_v34 = vadd.f32 %v867_v31, %v861_v26  ;;  %v779_v56 = vadd.f32 %v771_v53, %v694_v51  ;;  %vm952_vm0 = vcmp.eq.s32.totalorder %v2571_v36, %v950_v15  ;;  %v1028_v26 = vadd.s32 136, %v2569_v28  ;;  %v1260_v51 = vld [vmem:[#allocation7 + $0x68] sm:$0xff]  ;;  %v1321_v53 = vld [vmem:[#allocation7 + $0xd0] sm:$0xff]  ;;  %v1356_v15 = vld [vmem:[#allocation7 + $0x118] sm:$0xff] }
  0xee   : > { %1919 = vmatpush.msk.msrb.mxu0 %vm1044_vm7, %v2322_v10  ;;  %v1895_v17 = vsel %vm952_vm0, 1.0, %v2321_v48  ;;  %vm3101_vm0 = vcmp.eq.s32.totalorder %v2706_v19, %v2593_v4  ;;  %v1261_v48 = vld [vmem:[#allocation7 + $0x70] sm:$0xff] }
  0xef   : > { %v879_v41 = vmax.f32 %v873_v34, 0.0 }
  0xf0   : > { %v745_v24 = vpop.f32.mrf.mxu2  ;;  %1920 = vmatpush.msk.msrb.mxu0 %vm1043_vm10, %v2322_v10 }
  0xf1   : > { %v778_v27 = vadd.f32 %v745_v24, %v693_v21  ;;  %v2736_v21 = vadd.s32 48, %v2569_v28  ;;  %v2781_v24 = vadd.s32 24, %v2569_v28 }
  0xf2   : > { %v850_v29 = vpop.f32.mrf.mxu1  ;;  %1921 = vmatpush.msk.msrb.mxu0 %vm1042_vm12, %v2322_v10 }
  0xf3   : > { %v863_v32 = vadd.f32 %v830_v25, %v778_v27  ;;  %v860_v60 = vadd.f32 %v850_v29, %v775_v55  ;;  %v2796_v25 = vadd.s32 16, %v2569_v28  ;;  %v1027_v27 = vadd.s32 128, %v2569_v28  ;;  %v1259_v55 = vld [vmem:[#allocation7 + $0x60] sm:$0xff] }
  0xf4   : > { %1922 = vmatpush.msk.msrb.mxu0 %vm1041_vm14, %v2322_v10 }
  0xf5   : > { %v875_v35 = vadd.f32 %v867_v31, %v863_v32  ;;  %v872_v6 = vadd.f32 %v868_v61, %v860_v60  ;;  %v1258_v60 = vld [vmem:[#allocation7 + $0x58] sm:$0xff] }
  0xf6   : > { %1923 = vmatpush.msk.msrb.mxu0 %vm3117_vm1, %v2322_v10  ;;  %vm1154_vm1 = vcmp.eq.s32.totalorder %v1027_v27, %v2593_v4 }
  0xf7   : > { %v881_v39 = vmax.f32 %v875_v35, 0.0  ;;  %v878_v12 = vmax.f32 %v872_v6, 0.0  ;;  %v1388_v6 = vld [vmem:[#allocation7 + $0x148] sm:$0xff] }
  0xf8   : > { %1924 = vmatpush.msk.msrb.mxu0 %vm3098_vm4, %v2322_v10  ;;  %vm3102_vm4 = vcmp.eq.s32.totalorder %v2721_v20, %v2586_v59 }
  0xf9   : > { %916 = vmatpush.msrb.mxu2 %v881_v39 }
  0xfa   : > { %v853_v43 = vpop.f32.mrf.mxu1 }
  0xfb   : > { %917 = vmatpush.msrb.mxu2 %v879_v41  ;;  %v862_v57 = vadd.f32 %v853_v43, %v777_v54  ;;  %v1253_v43 = vld [vmem:[#allocation7 + $0x40] sm:$0xff] }
  0xfc   : > { %v1391_v54 = vld [vmem:[#allocation7 + $0x160] sm:$0xff] }
  0xfd   : > { %918 = vmatpush.msrb.mxu2 %v877_v47  ;;  %v874_v0 = vadd.f32 %v868_v61, %v862_v57  ;;  %v1320_v57 = vld [vmem:[#allocation7 + $0xc8] sm:$0xff] }
  0xfe   : > { %1890 = vmatmul.msk.f32.vlgmr.msrb.gmra.mxu2 %vm896_vm3, %v2579_v49 }
  0xff   : > { %976 = vmatpush.msra.mxu2 %v881_v39  ;;  %v880_v9 = vmax.f32 %v874_v0, 0.0  ;;  %v1257_v0 = vld [vmem:[#allocation7 + $0x50] sm:$0xff] }
 0x101   : > { %977 = vmatpush.msra.mxu2 %v879_v41  ;;  %v1264_v41 = vld [vmem:[#allocation7 + $0x88] sm:$0xff] }
 0x102   : > { %v856_v58 = vpop.f32.mrf.mxu1 }
 0x103   : > { %978 = vmatpush.msra.mxu2 %v877_v47  ;;  %v864_v62 = vadd.f32 %v856_v58, %v779_v56  ;;  %v1251_v47 = vld [vmem:[#allocation7 + $0x30] sm:$0xff]  ;;  %v1248_v56 = vld [vmem:[#allocation7 + $0x18] sm:$0xff] }
 0x104   : > { %v1390_v58 = vld [vmem:[#allocation7 + $0x158] sm:$0xff] }
 0x105   : > { %v876_v1 = vadd.f32 %v868_v61, %v864_v62  ;;  %1956 = vmatpush.msk.msrb.mxu2 %vm1153_vm6, %v2322_v10  ;;  %v1247_v61 = vld [vmem:[#allocation7 + $0x10] sm:$0xff]  ;;  %v1319_v62 = vld [vmem:[#allocation7 + $0xc0] sm:$0xff] }
 0x106   : > { %1891 = vmatmul.msk.f32.gmra.mxu2 %vm896_vm3, %v1889_v63 }
 0x107   : > { %v882_v7 = vmax.f32 %v876_v1, 0.0  ;;  %1957 = vmatpush.msk.msrb.mxu2 %vm1152_vm9, %v2322_v10  ;;  %v1246_v1 = vld [vmem:[#allocation7 + $0x8] sm:$0xff] }
 0x109   : > { %939 = vmatpush.msra.mxu3 %v882_v7  ;;  %1958 = vmatpush.msk.msrb.mxu2 %vm1151_vm11, %v2322_v10 }
 0x10b   : > { %940 = vmatpush.msra.mxu3 %v880_v9  ;;  %1959 = vmatpush.msk.msrb.mxu2 %vm1150_vm13, %v2322_v10 }
 0x10d   : > { %941 = vmatpush.msra.mxu3 %v878_v12  ;;  %1960 = vmatpush.msk.msrb.mxu2 %vm1149_vm15, %v2322_v10 }
 0x10e   : > { %1892 = vmatmul.msk.f32.vlgmr.msra.gmra.mxu3 %vm896_vm3, %v2579_v49  ;;  %1896 = vmatmul.msk.f32.vlgmr.msra.gmra.mxu2 %vm896_vm3, %v2634_v14 }
 0x10f   : > { %999 = vmatpush.msrb.mxu3 %v882_v7  ;;  %1961 = vmatpush.msk.msrb.mxu2 %vm1148_vm2, %v2322_v10  ;;  %v1256_v7 = vld [vmem:[#allocation7 + $0x48] sm:$0xff] }
 0x111   : > { %1000 = vmatpush.msrb.mxu3 %v880_v9  ;;  %1962 = vmatpush.msk.msrb.mxu2 %vm3099_vm8, %v2322_v10  ;;  %vm3103_vm8 = vcmp.eq.s32.totalorder %v2721_v20, %v2593_v4  ;;  %v1245_v9 = vld [vmem:[#allocation7] sm:$0xff] }
 0x113   : > { %1001 = vmatpush.msrb.mxu3 %v878_v12  ;;  %1963 = vmatpush.msk.msrb.mxu2 %vm3101_vm0, %v2322_v10  ;;  %vm3105_vm0 = vcmp.eq.s32.totalorder %v2736_v21, %v2593_v4  ;;  %v1317_v12 = vld [vmem:[#allocation7 + $0xb0] sm:$0xff] }
 0x115   : > { %1964 = vmatpush.msk.msrb.mxu2 %vm3103_vm8, %v2322_v10  ;;  %vm3107_vm8 = vcmp.eq.s32.totalorder %v2751_v22, %v2593_v4 }
 0x116   : > { %1893 = vmatmul.msk.f32.gmra.mxu3 %vm896_vm3, %v1889_v63  ;;  %1897 = vmatmul.msk.f32.gmra.mxu2 %vm896_vm3, %v1895_v17  ;;  %v1389_v63 = vld [vmem:[#allocation7 + $0x150] sm:$0xff] }
 0x117   : > { %1965 = vmatpush.msk.msrb.mxu2 %vm3105_vm0, %v2322_v10  ;;  %vm3109_vm0 = vcmp.eq.s32.totalorder %v2766_v23, %v2593_v4 }
 0x119   : > { %1966 = vmatpush.msk.msrb.mxu2 %vm3107_vm8, %v2322_v10  ;;  %vm3111_vm8 = vcmp.eq.s32.totalorder %v2781_v24, %v2593_v4 }
 0x11b   : > { %1967 = vmatpush.msk.msrb.mxu2 %vm3109_vm0, %v2322_v10  ;;  %vm3113_vm0 = vcmp.eq.s32.totalorder %v2796_v25, %v2593_v4 }
 0x11d   : > { %1968 = vmatpush.msk.msrb.mxu2 %vm3111_vm8, %v2322_v10  ;;  %vm3115_vm8 = vcmp.eq.s32.totalorder %v2576_v42, %v2593_v4 }
 0x11e   : > { %1898 = vmatmul.msk.f32.vlgmr.msrb.gmra.mxu3 %vm896_vm3, %v2634_v14 }
 0x11f   : > { %1969 = vmatpush.msk.msrb.mxu2 %vm3113_vm0, %v2322_v10  ;;  %vm1138_vm0 = vcmp.eq.s32.totalorder %v2569_v28, %v2593_v4 }
 0x121   : > { %1970 = vmatpush.msk.msrb.mxu2 %vm3115_vm8, %v2322_v10  ;;  %vm1155_vm8 = vcmp.eq.s32.totalorder %v1028_v26, %v2593_v4 }
 0x122   : > { %1972 = vmatpush.msk.msra.mxu3 %vm1155_vm8, %v2322_v10  ;;  %vm1242_vm8 = vcmask 584704  }
 0x123   : > { %1971 = vmatpush.msk.msrb.mxu2 %vm1138_vm0, %v2322_v10 }
 0x124   : > { %1973 = vmatpush.msk.msra.mxu3 %vm1154_vm1, %v2322_v10  ;;  %vm1240_vm1 = vcmask 588800  }
 0x125   : > { %1402 = vmatpush.msra.mxu2 %v1391_v54 }
 0x126   : > { %1899 = vmatmul.msk.f32.gmra.mxu3 %vm896_vm3, %v1895_v17  ;;  %vm3100_vm3 = vcmp.eq.s32.totalorder %v2706_v19, %v2586_v59  ;;  %v1387_v17 = vld [vmem:[#allocation7 + $0x140] sm:$0xff] }
 0x127   : > { %1925 = vmatpush.msk.msrb.mxu0 %vm3100_vm3, %v2322_v10  ;;  %vm3104_vm3 = vcmp.eq.s32.totalorder %v2736_v21, %v2586_v59  ;;  %1332 = vmatpush.msrb.mxu3 %v1321_v53 }
 0x128   : > { %1403 = vmatpush.msra.mxu2 %v1390_v58 }
 0x129   : > { %1926 = vmatpush.msk.msrb.mxu0 %vm3102_vm4, %v2322_v10  ;;  %vm3106_vm4 = vcmp.eq.s32.totalorder %v2751_v22, %v2586_v59  ;;  %1333 = vmatpush.msrb.mxu3 %v1320_v57 }
 0x12a   : > { %1404 = vmatpush.msra.mxu2 %v1389_v63 }
 0x12b   : > { %1927 = vmatpush.msk.msrb.mxu0 %vm3104_vm3, %v2322_v10  ;;  %vm3108_vm3 = vcmp.eq.s32.totalorder %v2766_v23, %v2586_v59  ;;  %1334 = vmatpush.msrb.mxu3 %v1319_v62 }
 0x12c   : > { %1405 = vmatpush.msra.mxu2 %v1388_v6 }
 0x12d   : > { %1928 = vmatpush.msk.msrb.mxu0 %vm3106_vm4, %v2322_v10  ;;  %vm3110_vm4 = vcmp.eq.s32.totalorder %v2781_v24, %v2586_v59  ;;  %1335 = vmatpush.msrb.mxu3 %v1318_v2 }
 0x12e   : > { %1406 = vmatpush.msra.mxu2 %v1387_v17  ;;  %v2116_v17 = vld [vmem:[%s3084_s4] ss:$0 sm:$0xff] }
 0x12f   : > { %1929 = vmatpush.msk.msrb.mxu0 %vm3108_vm3, %v2322_v10  ;;  %vm3112_vm3 = vcmp.eq.s32.totalorder %v2796_v25, %v2586_v59  ;;  %1336 = vmatpush.msrb.mxu3 %v1317_v12 }
 0x131   : > { %1930 = vmatpush.msk.msrb.mxu0 %vm3110_vm4, %v2322_v10  ;;  %vm3114_vm4 = vcmp.eq.s32.totalorder %v2576_v42, %v2586_v59 }
 0x133   : > { %1931 = vmatpush.msk.msrb.mxu0 %vm3112_vm3, %v2322_v10  ;;  %vm3116_vm3 = vcmp.eq.s32.totalorder %v2569_v28, %v2586_v59 }
 0x135   : > { %1932 = vmatpush.msk.msrb.mxu0 %vm3114_vm4, %v2322_v10  ;;  %vm1047_vm4 = vcmp.eq.s32.totalorder %v1028_v26, %v2586_v59  ;;  %v1316_v26 = vld [vmem:[#allocation7 + $0xa8] sm:$0xff] }
 0x136   : > { %1934 = vmatpush.msk.msra.mxu1 %vm1047_vm4, %v2322_v10  ;;  %vm1084_vm4 = vcmask 130048   ;;  %1337 = vmatpush.msrb.mxu3 %v1316_v26 }
 0x137   : > { %1933 = vmatpush.msk.msrb.mxu0 %vm3116_vm3, %v2322_v10  ;;  %vm1046_vm3 = vcmp.eq.s32.totalorder %v1027_v27, %v2586_v59  ;;  %v1355_v27 = vld [vmem:[#allocation7 + $0x110] sm:$0xff] }
 0x138   : > { %1935 = vmatpush.msk.msra.mxu1 %vm1046_vm3, %v2322_v10  ;;  %vm1422_vm3 = vcmask 64512  }
 0x139   : > { %1298 = vmatpush.msra.mxu0 %v1253_v43  ;;  %v1348_v43 = vld [vmem:[#allocation7 + $0xd8] sm:$0xff] }
 0x13a   : > { %1275 = vmatpush.msrb.mxu1 %v1264_v41  ;;  %v1349_v41 = vld [vmem:[#allocation7 + $0xe0] sm:$0xff] }
 0x13b   : > { %1299 = vmatpush.msra.mxu0 %v1252_v45 }
 0x13c   : > { %1276 = vmatpush.msrb.mxu1 %v1263_v44 }
 0x13d   : > { %1300 = vmatpush.msra.mxu0 %v1251_v47 }
 0x13e   : > { %1277 = vmatpush.msrb.mxu1 %v1262_v46 }
 0x13f   : > { %1301 = vmatpush.msra.mxu0 %v1250_v50 }
 0x140   : > { %1278 = vmatpush.msrb.mxu1 %v1261_v48 }
 0x141   : > { %1302 = vmatpush.msra.mxu0 %v1249_v52 }
 0x142   : > { %1279 = vmatpush.msrb.mxu1 %v1260_v51 }
 0x143   : > { %1303 = vmatpush.msra.mxu0 %v1248_v56 }
 0x144   : > { %1280 = vmatpush.msrb.mxu1 %v1259_v55 }
 0x145   : > { %1304 = vmatpush.msra.mxu0 %v1247_v61 }
 0x146   : > { %1281 = vmatpush.msrb.mxu1 %v1258_v60 }
 0x147   : > { %1305 = vmatpush.msra.mxu0 %v1246_v1 }
 0x148   : > { %1282 = vmatpush.msrb.mxu1 %v1257_v0 }
 0x149   : > { %1306 = vmatpush.msra.mxu0 %v1245_v9 }
 0x14a   : > { %1283 = vmatpush.msrb.mxu1 %v1256_v7 }
 0x181   : > { %v920_v29 = vpop.f32.mrf.mxu2 }
 0x189   : > { %v923_v30 = vpop.f32.mrf.mxu2 }
 0x191   : > { %v943_v31 = vpop.f32.mrf.mxu3  ;;  %v980_v32 = vpop.f32.mrf.mxu2 }
 0x192   : > { %v1009_v33 = vmax.f32 %v920_v29, %v980_v32  ;;  %v1386_v29 = vld [vmem:[#allocation7 + $0x138] sm:$0xff]  ;;  %v1385_v32 = vld [vmem:[#allocation7 + $0x130] sm:$0xff] }
 0x193   : > { %1407 = vmatpush.msra.mxu2 %v1386_v29 }
 0x194   : > { %1107 = vmatmul.f32.vlgmr.msrb.gmra.mxu0 %v1009_v33  ;;  %1208 = vmatmul.f32.vlgmr.msrb.gmra.mxu2 %v1009_v33  ;;  %v1314_v33 = vld [vmem:[#allocation7 + $0x98] sm:$0xff] }
 0x195   : > { %1408 = vmatpush.msra.mxu2 %v1385_v32  ;;  %v1588_v32 = vld [vmem:[#allocation9 + $0xb0] sm:$0xff] }
 0x199   : > { %v946_v34 = vpop.f32.mrf.mxu3  ;;  %v983_v35 = vpop.f32.mrf.mxu2 }
 0x19a   : > { %v1011_v36 = vmax.f32 %v923_v30, %v983_v35  ;;  %v1315_v30 = vld [vmem:[#allocation7 + $0xa0] sm:$0xff]  ;;  %v1384_v35 = vld [vmem:[#allocation7 + $0x128] sm:$0xff] }
 0x19b   : > { %1338 = vmatpush.msrb.mxu3 %v1315_v30  ;;  %1409 = vmatpush.msra.mxu2 %v1384_v35  ;;  %v1587_v35 = vld [vmem:[#allocation9 + $0xa8] sm:$0xff] }
 0x19c   : > { %1110 = vmatmul.f32.gmra.mxu0 %v1011_v36  ;;  %1211 = vmatmul.f32.gmra.mxu2 %v1011_v36  ;;  %v1313_v36 = vld [vmem:[#allocation7 + $0x90] sm:$0xff] }
 0x19d   : > { %1339 = vmatpush.msrb.mxu3 %v1314_v33  ;;  %v1621_v33 = vld [vmem:[#allocation9 + $0xe8] sm:$0xff] }
 0x19f   : > { %1340 = vmatpush.msrb.mxu3 %v1313_v36  ;;  %v1586_v36 = vld [vmem:[#allocation9 + $0xa0] sm:$0xff] }
 0x1a1   : > { %v1003_v37 = vpop.f32.mrf.mxu3 }
 0x1a2   : > { %v1010_v38 = vmax.f32 %v943_v31, %v1003_v37  ;;  %v1354_v31 = vld [vmem:[#allocation7 + $0x108] sm:$0xff]  ;;  %v1352_v37 = vld [vmem:[#allocation7 + $0xf8] sm:$0xff] }
 0x1a4   : > { %1936 = vmatmul.msk.f32.vlgmr.msra.gmra.mxu1 %vm1084_vm4, %v1010_v38  ;;  %1974 = vmatmul.msk.f32.vlgmr.msra.gmra.mxu3 %vm1084_vm4, %v1010_v38  ;;  %v1383_v38 = vld [vmem:[#allocation7 + $0x120] sm:$0xff] }
 0x1a5   : > { %1367 = vmatpush.msra.mxu1 %v1356_v15  ;;  %1410 = vmatpush.msra.mxu2 %v1383_v38  ;;  %v1585_v38 = vld [vmem:[#allocation9 + $0x98] sm:$0xff] }
 0x1a7   : > { %1368 = vmatpush.msra.mxu1 %v1355_v27 }
 0x1a9   : > { %v1006_v39 = vpop.f32.mrf.mxu3  ;;  %1369 = vmatpush.msra.mxu1 %v1354_v31  ;;  %v1589_v31 = vld [vmem:[#allocation9 + $0xb8] sm:$0xff] }
 0x1aa   : > { %v1012_v40 = vmax.f32 %v946_v34, %v1006_v39  ;;  %v1353_v34 = vld [vmem:[#allocation7 + $0x100] sm:$0xff]  ;;  %v1351_v39 = vld [vmem:[#allocation7 + $0xf0] sm:$0xff] }
 0x1ab   : > { %1370 = vmatpush.msra.mxu1 %v1353_v34  ;;  %v1620_v34 = vld [vmem:[#allocation9 + $0xe0] sm:$0xff] }
 0x1ac   : > { %1937 = vmatmul.msk.f32.gmra.mxu1 %vm1084_vm4, %v1012_v40  ;;  %1975 = vmatmul.msk.f32.gmra.mxu3 %vm1084_vm4, %v1012_v40  ;;  %v1350_v40 = vld [vmem:[#allocation7 + $0xe8] sm:$0xff]  ;;  %vm3143_vm4 = vcmp.eq.s32.totalorder %v2766_v23, %v2593_v4 }
 0x1ad   : > { %1371 = vmatpush.msra.mxu1 %v1352_v37  ;;  %v1619_v37 = vld [vmem:[#allocation9 + $0xd8] sm:$0xff] }
 0x1af   : > { %1372 = vmatpush.msra.mxu1 %v1351_v39  ;;  %v1618_v39 = vld [vmem:[#allocation9 + $0xd0] sm:$0xff] }
 0x1b1   : > { %1373 = vmatpush.msra.mxu1 %v1350_v40  ;;  %v1584_v40 = vld [vmem:[#allocation9 + $0x90] sm:$0xff] }
 0x1b3   : > { %1374 = vmatpush.msra.mxu1 %v1349_v41  ;;  %v1617_v41 = vld [vmem:[#allocation9 + $0xc8] sm:$0xff] }
 0x1b5   : > { %1375 = vmatpush.msra.mxu1 %v1348_v43  ;;  %v1616_v43 = vld [vmem:[#allocation9 + $0xc0] sm:$0xff] }
 0x211   : > { %v1108_v45 = vpop.f32.mrf.mxu0 }
 0x217   : > { %v1209_v46 = vpop.f32.mrf.mxu2 }
 0x219   : > { %v1111_v53 = vpop.f32.mrf.mxu0 }
 0x21f   : > { %v1212_v54 = vpop.f32.mrf.mxu2 }
 0x221   : > { %v1131_v44 = vpop.f32.mrf.mxu1 }
 0x222   : > { %v1132_v48 = vadd.f32 %v1131_v44, %v1108_v45  ;;  %v1583_v44 = vld [vmem:[#allocation9 + $0x88] sm:$0xff]  ;;  %v1582_v45 = vld [vmem:[#allocation9 + $0x80] sm:$0xff] }
 0x227   : > { %v1232_v47 = vpop.f32.mrf.mxu3 }
 0x228   : > { %v1233_v50 = vadd.f32 %v1232_v47, %v1209_v46  ;;  %v1664_v46 = vld [vmem:[%s3087_s7 + $0x78] sm:$0xff]  ;;  %v1663_v47 = vld [vmem:[%s3087_s7 + $0x70] sm:$0xff] }
 0x229   : > { %v1134_v52 = vpop.f32.mrf.mxu1 }
 0x22a   : > { %v1238_v51 = vmax.f32 %v1132_v48, %v1233_v50  ;;  %v1135_v56 = vadd.f32 %v1134_v52, %v1111_v53  ;;  %v1662_v48 = vld [vmem:[%s3087_s7 + $0x68] sm:$0xff]  ;;  %v1661_v50 = vld [vmem:[%s3087_s7 + $0x60] sm:$0xff]  ;;  %v1659_v52 = vld [vmem:[%s3087_s7 + $0x50] sm:$0xff] }
 0x22b   : > { %v1658_v53 = vld [vmem:[%s3087_s7 + $0x48] sm:$0xff] }
 0x22c   : > { %1241 = vst.msk [vmem:[#allocation2] sm:$0xff] %vm1240_vm1, %v1238_v51  ;;  %v1660_v51 = vld [vmem:[%s3087_s7 + $0x58] sm:$0xff] }
 0x22f   : > { %v1235_v55 = vpop.f32.mrf.mxu3 }
 0x230   : > { %v1236_v57 = vadd.f32 %v1235_v55, %v1212_v54  ;;  %v1657_v54 = vld [vmem:[%s3087_s7 + $0x40] sm:$0xff] }
 0x232   : > { %v1239_v58 = vmax.f32 %v1135_v56, %v1236_v57 }
 0x233   : > { %v1244_v60 = vld [vmem:[#allocation2] sm:$0xff] }
 0x234   : > { %1243 = vst.msk [vmem:[#allocation2 + $0x8] sm:$0xf] %vm1242_vm8, %v1239_v58  ;;  %1977 = vmatmul.msk.f32.vlgmr.msra.gmra.mxu0 %vm1240_vm1, %v1244_v60  ;;  %vm3145_vm8 = vcmp.eq.s32.totalorder %v2781_v24, %v2593_v4 }
 0x23b   : > { %v1254_v61 = vld [vmem:[#allocation2 + $0x1] sm:$0xff] }
 0x23c   : > { %v1311_v62 = vld [vmem:[#allocation2 + $0x2] sm:$0xff]  ;;  %1976 = vmatmul.msk.f32.vlgmr.msrb.gmra.mxu1 %vm1240_vm1, %v1254_v61 }
 0x23d   : > { %v1381_v63 = vld [vmem:[#allocation2 + $0x4] sm:$0xff]  ;;  %1978 = vmatmul.msk.f32.vlgmr.msrb.gmra.mxu3 %vm1240_vm1, %v1311_v62  ;;  %1533 = vmatpush.msrb.mxu1 %v1520_v5 }
 0x23e   : > { %1980 = vmatmul.msk.f32.vlgmr.msra.gmra.mxu2 %vm1240_vm1, %v1381_v63  ;;  %v1346_v0 = vld [vmem:[#allocation2 + $0x3] sm:$0xff]  ;;  %v1656_v63 = vld [vmem:[%s3087_s7 + $0x38] sm:$0xff] }
 0x23f   : > { %1534 = vmatpush.msrb.mxu1 %v1519_v8  ;;  %v1694_v8 = vld [vmem:[#allocation10 + $0x38] sm:$0xff] }
 0x241   : > { %1535 = vmatpush.msrb.mxu1 %v1518_v13  ;;  %v1511_v13 = vld [vmem:[%s3086_s6] sm:$0x1] }
 0x244   : > { %1979 = vmatmul.msk.f32.vlgmr.msra.gmra.mxu1 %vm1240_vm1, %v1346_v0  ;;  %vm3144_vm1 = vcmp.eq.s32.totalorder %v2766_v23, %v2586_v59  ;;  %v1623_v23 = vld [vmem:[#allocation9 + $0xf8] sm:$0xff] }
 0x245   : > { %v1655_v0 = vld [vmem:[%s3087_s7 + $0x30] sm:$0xff] }
 0x2b1   : > { %v1308_v2 = vpop.f32.mrf.mxu0 }
 0x2b9   : > { %v1285_v1 = vpop.f32.mrf.mxu1 }
 0x2ba   : > { %v1309_v6 = vadd.f32 %v1308_v2, %v1285_v1  ;;  %v1654_v1 = vld [vmem:[%s3087_s7 + $0x28] sm:$0xff]  ;;  %v1653_v2 = vld [vmem:[%s3087_s7 + $0x20] sm:$0xff] }
 0x2c0   : > { %v1342_v7 = vpop.f32.mrf.mxu3 }
 0x2c1   : > { %v1345_v9 = vadd.f32 %v1342_v7, %v1309_v6  ;;  %v1377_v12 = vpop.f32.mrf.mxu1  ;;  %v1412_v26 = vpop.f32.mrf.mxu2  ;;  %v1652_v6 = vld [vmem:[%s3087_s7 + $0x18] sm:$0xff]  ;;  %v1651_v7 = vld [vmem:[%s3087_s7 + $0x10] sm:$0xff] }
 0x2c3   : > { %v1380_v15 = vadd.f32 %v1377_v12, %v1345_v9  ;;  %v1650_v9 = vld [vmem:[%s3087_s7 + $0x8] sm:$0xff]  ;;  %v1649_v12 = vld [vmem:[%s3087_s7] sm:$0xff] }
 0x2c5   : > { %v1415_v27 = vadd.f32 %v1412_v26, %v1380_v15  ;;  %v1702_v15 = vld [vmem:[#allocation10 + $0x78] sm:$0xff]  ;;  %v1700_v26 = vld [vmem:[#allocation10 + $0x68] sm:$0xff] }
 0x2c7   : > { %v1420_v29 = vadd.f32 %v2116_v17, %v1415_v27  ;;  %v1701_v17 = vld [vmem:[#allocation10 + $0x70] sm:$0xff]  ;;  %v1699_v27 = vld [vmem:[#allocation10 + $0x60] sm:$0xff] }
 0x2c9   : > { %v1421_v30 = vmax.f32 %v1420_v29, 0.0  ;;  %v1698_v29 = vld [vmem:[#allocation10 + $0x58] sm:$0xff] }
 0x2cb   : > { %1440 = vmatpush.msrb.mxu0 %v1421_v30  ;;  %1462 = vmatpush.msra.mxu3 %v1421_v30  ;;  %v1697_v30 = vld [vmem:[#allocation10 + $0x50] sm:$0xff] }
 0x2cc   : > { %1982 = vmatmul.msk.f32.vlgmr.msra.gmra.mxu3 %vm1422_vm3, %v2634_v14  ;;  %1981 = vmatmul.msk.f32.vlgmr.msrb.gmra.mxu0 %vm1422_vm3, %v2579_v49  ;;  %vm3146_vm3 = vcmp.eq.s32.totalorder %v2781_v24, %v2586_v59  ;;  %v1555_v49 = vld [vmem:[#allocation9 + $0x78] sm:$0xff]  ;;  %v1517_v14 = vld [vmem:[#allocation9 + $0x20] sm:$0xff]  ;;  %v1622_v24 = vld [vmem:[#allocation9 + $0xf0] sm:$0xff] }
 0x2cd   : > { %1999 = vmatpush.msk.msrb.mxu3 %vm1153_vm6, %v2322_v10  ;;  %1983 = vmatpush.msk.msra.mxu0 %vm1045_vm5, %v2322_v10  ;;  %vm3132_vm5 = vcmp.eq.s32.totalorder %v2649_v16, %v2586_v59  ;;  %vm3133_vm6 = vcmp.eq.s32.totalorder %v2699_v18, %v2593_v4  ;;  %v1550_v16 = vld [vmem:[#allocation9 + $0x50] sm:$0xff] }
 0x2ce   : > { %1567 = vmatpush.msrb.mxu2 %v1555_v49  ;;  %1536 = vmatpush.msrb.mxu1 %v1517_v14  ;;  %v1696_v49 = vld [vmem:[#allocation10 + $0x48] sm:$0xff] }
 0x2cf   : > { %2000 = vmatpush.msk.msrb.mxu3 %vm1152_vm9, %v2322_v10  ;;  %1984 = vmatpush.msk.msra.mxu0 %vm1044_vm7, %v2322_v10  ;;  %vm3134_vm7 = vcmp.eq.s32.totalorder %v2699_v18, %v2586_v59  ;;  %vm3135_vm9 = vcmp.eq.s32.totalorder %v2706_v19, %v2593_v4  ;;  %v1516_v18 = vld [vmem:[#allocation9 + $0x18] sm:$0xff] }
 0x2d0   : > { %1568 = vmatpush.msrb.mxu2 %v1554_v3  ;;  %1537 = vmatpush.msrb.mxu1 %v1516_v18  ;;  %v1695_v3 = vld [vmem:[#allocation10 + $0x40] sm:$0xff] }
 0x2d1   : > { %2001 = vmatpush.msk.msrb.mxu3 %vm1151_vm11, %v2322_v10  ;;  %1985 = vmatpush.msk.msra.mxu0 %vm1043_vm10, %v2322_v10  ;;  %vm3136_vm10 = vcmp.eq.s32.totalorder %v2706_v19, %v2586_v59  ;;  %vm3137_vm11 = vcmp.eq.s32.totalorder %v2721_v20, %v2593_v4  ;;  %v1515_v19 = vld [vmem:[#allocation9 + $0x10] sm:$0xff] }
 0x2d2   : > { %1569 = vmatpush.msrb.mxu2 %v1553_v11  ;;  %1538 = vmatpush.msrb.mxu1 %v1515_v19  ;;  %v1693_v11 = vld [vmem:[#allocation10 + $0x30] sm:$0xff] }
 0x2d3   : > { %2002 = vmatpush.msk.msrb.mxu3 %vm1150_vm13, %v2322_v10  ;;  %1986 = vmatpush.msk.msra.mxu0 %vm1042_vm12, %v2322_v10  ;;  %vm3138_vm12 = vcmp.eq.s32.totalorder %v2721_v20, %v2586_v59  ;;  %vm3139_vm13 = vcmp.eq.s32.totalorder %v2736_v21, %v2593_v4  ;;  %v1549_v20 = vld [vmem:[#allocation9 + $0x48] sm:$0xff] }
 0x2d5   : > { %2003 = vmatpush.msk.msrb.mxu3 %vm1149_vm15, %v2322_v10  ;;  %1987 = vmatpush.msk.msra.mxu0 %vm1041_vm14, %v2322_v10  ;;  %vm3140_vm14 = vcmp.eq.s32.totalorder %v2736_v21, %v2586_v59  ;;  %vm3141_vm15 = vcmp.eq.s32.totalorder %v2751_v22, %v2593_v4  ;;  %v1514_v21 = vld [vmem:[#allocation9 + $0x8] sm:$0xff] }
 0x2d6   : > { %1539 = vmatpush.msrb.mxu1 %v1514_v21 }
 0x2d7   : > { %2004 = vmatpush.msk.msrb.mxu3 %vm1148_vm2, %v2322_v10  ;;  %1988 = vmatpush.msk.msra.mxu0 %vm3132_vm5, %v2322_v10  ;;  %vm3142_vm2 = vcmp.eq.s32.totalorder %v2751_v22, %v2586_v59  ;;  %vm3147_vm5 = vcmp.eq.s32.totalorder %v2796_v25, %v2593_v4  ;;  %v1548_v22 = vld [vmem:[#allocation9 + $0x40] sm:$0xff] }
 0x2d9   : > { %2005 = vmatpush.msk.msrb.mxu3 %vm3133_vm6, %v2322_v10  ;;  %1989 = vmatpush.msk.msra.mxu0 %vm3134_vm7, %v2322_v10  ;;  %vm3148_vm6 = vcmp.eq.s32.totalorder %v2796_v25, %v2586_v59  ;;  %vm3149_vm7 = vcmp.eq.s32.totalorder %v2576_v42, %v2593_v4  ;;  %v1551_v4 = vld [vmem:[#allocation9 + $0x58] sm:$0xff]  ;;  %v1513_v25 = vld [vmem:[#allocation9] sm:$0xff] }
 0x2da   : > { %1540 = vmatpush.msrb.mxu1 %v1513_v25  ;;  %v1665_v25 = vld [vmem:[%s3088_s8] sm:$0x1] }
 0x2db   : > { %2006 = vmatpush.msk.msrb.mxu3 %vm3135_vm9, %v2322_v10  ;;  %1990 = vmatpush.msk.msra.mxu0 %vm3136_vm10, %v2322_v10  ;;  %vm3150_vm9 = vcmp.eq.s32.totalorder %v2576_v42, %v2586_v59  ;;  %vm3151_vm10 = vcmp.eq.s32.totalorder %v2569_v28, %v2586_v59  ;;  %v1552_v42 = vld [vmem:[#allocation9 + $0x60] sm:$0xff] }
 0x2dc   : > { %1570 = vmatpush.msrb.mxu2 %v1552_v42  ;;  %1601 = vmatpush.msra.mxu1 %v1589_v31  ;;  %v1692_v42 = vld [vmem:[#allocation10 + $0x28] sm:$0xff] }
 0x2dd   : > { %2007 = vmatpush.msk.msrb.mxu3 %vm3137_vm11, %v2322_v10  ;;  %1991 = vmatpush.msk.msra.mxu0 %vm3138_vm12, %v2322_v10  ;;  %vm1521_vm11 = vcmask 523264  }
 0x2de   : > { %1571 = vmatpush.msrb.mxu2 %v1551_v4  ;;  %1602 = vmatpush.msra.mxu1 %v1588_v32 }
 0x2df   : > { %2008 = vmatpush.msk.msrb.mxu3 %vm3139_vm13, %v2322_v10  ;;  %1992 = vmatpush.msk.msra.mxu0 %vm3140_vm14, %v2322_v10 }
 0x2e0   : > { %1572 = vmatpush.msrb.mxu2 %v1550_v16  ;;  %1603 = vmatpush.msra.mxu1 %v1587_v35  ;;  %v1691_v16 = vld [vmem:[#allocation10 + $0x20] sm:$0xff] }
 0x2e1   : > { %2009 = vmatpush.msk.msrb.mxu3 %vm3141_vm15, %v2322_v10  ;;  %1993 = vmatpush.msk.msra.mxu0 %vm3142_vm2, %v2322_v10 }
 0x2e2   : > { %1573 = vmatpush.msrb.mxu2 %v1549_v20  ;;  %1604 = vmatpush.msra.mxu1 %v1586_v36 }
 0x2e3   : > { %2010 = vmatpush.msk.msrb.mxu3 %vm3143_vm4, %v2322_v10  ;;  %1994 = vmatpush.msk.msra.mxu0 %vm3144_vm1, %v2322_v10 }
 0x2e4   : > { %1574 = vmatpush.msrb.mxu2 %v1548_v22  ;;  %1605 = vmatpush.msra.mxu1 %v1585_v38  ;;  %v1689_v22 = vld [vmem:[#allocation10 + $0x10] sm:$0xff] }
 0x2e5   : > { %2011 = vmatpush.msk.msrb.mxu3 %vm3145_vm8, %v2322_v10  ;;  %1995 = vmatpush.msk.msra.mxu0 %vm3146_vm3, %v2322_v10 }
 0x2e6   : > { %1635 = vmatpush.msra.mxu2 %v1623_v23  ;;  %1606 = vmatpush.msra.mxu1 %v1584_v40  ;;  %v1688_v23 = vld [vmem:[#allocation10 + $0x8] sm:$0xff] }
 0x2e7   : > { %2012 = vmatpush.msk.msrb.mxu3 %vm3147_vm5, %v2322_v10  ;;  %1996 = vmatpush.msk.msra.mxu0 %vm3148_vm6, %v2322_v10 }
 0x2e8   : > { %1636 = vmatpush.msra.mxu2 %v1622_v24  ;;  %1607 = vmatpush.msra.mxu1 %v1583_v44  ;;  %v1687_v24 = vld [vmem:[#allocation10] sm:$0xff] }
 0x2e9   : > { %2013 = vmatpush.msk.msrb.mxu3 %vm3149_vm7, %v2322_v10  ;;  %1997 = vmatpush.msk.msra.mxu0 %vm3150_vm9, %v2322_v10 }
 0x2ea   : > { %1637 = vmatpush.msra.mxu2 %v1621_v33  ;;  %1608 = vmatpush.msra.mxu1 %v1582_v45 }
 0x2eb   : > { %2014 = vmatpush.msk.msrb.mxu3 %vm1138_vm0, %v2322_v10  ;;  %1998 = vmatpush.msk.msra.mxu0 %vm3151_vm10, %v2322_v10  ;;  %vm1509_vm0 = vcmask 519168  }
 0x2ec   : > { %1638 = vmatpush.msra.mxu2 %v1620_v34  ;;  %v1703_v34 = vld [vmem:[%s3090_s10] sm:$0x1] }
 0x2ed   : > { %1666 = vmatpush.msrb.mxu0 %v1664_v46  ;;  %1704 = vmatpush.msra.mxu3 %v1702_v15 }
 0x2ee   : > { %1639 = vmatpush.msra.mxu2 %v1619_v37 }
 0x2ef   : > { %1667 = vmatpush.msrb.mxu0 %v1663_v47  ;;  %1705 = vmatpush.msra.mxu3 %v1701_v17 }
 0x2f0   : > { %1640 = vmatpush.msra.mxu2 %v1618_v39 }
 0x2f1   : > { %1668 = vmatpush.msrb.mxu0 %v1662_v48  ;;  %1706 = vmatpush.msra.mxu3 %v1700_v26 }
 0x2f2   : > { %1641 = vmatpush.msra.mxu2 %v1617_v41 }
 0x2f3   : > { %1669 = vmatpush.msrb.mxu0 %v1661_v50  ;;  %1707 = vmatpush.msra.mxu3 %v1699_v27 }
 0x2f4   : > { %1642 = vmatpush.msra.mxu2 %v1616_v43 }
 0x2f5   : > { %1670 = vmatpush.msrb.mxu0 %v1660_v51  ;;  %1708 = vmatpush.msra.mxu3 %v1698_v29 }
 0x2f7   : > { %1671 = vmatpush.msrb.mxu0 %v1659_v52  ;;  %1709 = vmatpush.msra.mxu3 %v1697_v30 }
 0x2f9   : > { %1672 = vmatpush.msrb.mxu0 %v1658_v53  ;;  %1710 = vmatpush.msra.mxu3 %v1696_v49 }
 0x2fb   : > { %1673 = vmatpush.msrb.mxu0 %v1657_v54  ;;  %1711 = vmatpush.msra.mxu3 %v1695_v3 }
 0x2fd   : > { %1674 = vmatpush.msrb.mxu0 %v1656_v63  ;;  %1712 = vmatpush.msra.mxu3 %v1694_v8 }
 0x2ff   : > { %1675 = vmatpush.msrb.mxu0 %v1655_v0  ;;  %1713 = vmatpush.msra.mxu3 %v1693_v11 }
 0x301   : > { %1676 = vmatpush.msrb.mxu0 %v1654_v1  ;;  %1714 = vmatpush.msra.mxu3 %v1692_v42 }
 0x303   : > { %1677 = vmatpush.msrb.mxu0 %v1653_v2  ;;  %1715 = vmatpush.msra.mxu3 %v1691_v16 }
 0x305   : > { %1678 = vmatpush.msrb.mxu0 %v1652_v6 }
 0x307   : > { %1679 = vmatpush.msrb.mxu0 %v1651_v7 }
 0x309   : > { %1680 = vmatpush.msrb.mxu0 %v1650_v9 }
 0x30b   : > { %1681 = vmatpush.msrb.mxu0 %v1649_v12 }
 0x349   : > { %v1442_v28 = vpop.f32.mrf.mxu0 }
 0x34f   : > { %v1464_v59 = vpop.f32.mrf.mxu3 }
 0x350   : > { %v1467_v10 = vmax.f32 %v1442_v28, %v1464_v59  ;;  %v1690_v59 = vld [vmem:[#allocation10 + $0x18] sm:$0xff] }
 0x351   : > { %1716 = vmatpush.msra.mxu3 %v1690_v59 }
 0x352   : > { %1504 = vmatmul.f32.vlgmr.msrb.gmra.mxu3 %v1467_v10  ;;  %1484 = vmatmul.f32.vlgmr.msra.gmra.mxu0 %v1467_v10 }
 0x353   : > { %1717 = vmatpush.msra.mxu3 %v1689_v22 }
 0x355   : > { %1718 = vmatpush.msra.mxu3 %v1688_v23 }
 0x357   : > { %1719 = vmatpush.msra.mxu3 %v1687_v24 }
 0x3cf   : > { %v1485_v55 = vpop.f32.mrf.mxu0 }
 0x3d5   : > { %v1505_v56 = vpop.f32.mrf.mxu3 }
 0x3d6   : > { %v1508_v57 = vmax.f32 %v1485_v55, %v1505_v56 }
 0x3d8   : > { %1510 = vst.msk [vmem:[#allocation3] sm:$0xf] %vm1509_vm0, %v1508_v57 }
 0x3df   : > { %v1546_v58 = vld [vmem:[#allocation3 + $0x1] sm:$0x1]  ;;  %v1512_v60 = vld [vmem:[#allocation3] sm:$0x1]  ;;  %v1614_v61 = vld [vmem:[#allocation3 + $0x3] sm:$0x1] }
 0x3e0   : > { %2016 = vmatmul.msk.f32.vlgmr.msrb.gmra.mxu2 %vm1521_vm11, %v1546_v58  ;;  %2015 = vmatmul.msk.f32.vlgmr.msrb.gmra.mxu1 %vm1521_vm11, %v1512_v60  ;;  %v1580_v62 = vld [vmem:[#allocation3 + $0x2] sm:$0x1] }
 0x3e8   : > { %2018 = vmatmul.msk.f32.vlgmr.msra.gmra.mxu2 %vm1521_vm11, %v1614_v61  ;;  %2017 = vmatmul.msk.f32.vlgmr.msra.gmra.mxu1 %vm1521_vm11, %v1580_v62 }
 0x45d   : > { %v1542_v5 = vpop.f32.mrf.mxu1 }
 0x45e   : > { %v1545_v4 = vadd.f32 %v1542_v5, %v1511_v13 }
 0x463   : > { %v1576_v14 = vpop.f32.mrf.mxu2 }
 0x464   : > { %v1579_v28 = vadd.f32 %v1576_v14, %v1545_v4 }
 0x465   : > { %v1610_v10 = vpop.f32.mrf.mxu1 }
 0x466   : > { %v1613_v18 = vadd.f32 %v1610_v10, %v1579_v28 }
 0x46b   : > { %v1644_v19 = vpop.f32.mrf.mxu2 }
 0x46c   : > { %v1647_v20 = vadd.f32 %v1644_v19, %v1613_v18 }
 0x46e   : > { %v1648_v21 = vmax.f32 %v1647_v20, 0.0 }
 0x470   : > { %1682 = vmatmul.f32.vlgmr.msrb.gmra.mxu0 %v1648_v21 }
 0x4ed   : > { %v1683_v31 = vpop.f32.mrf.mxu0 }
 0x4ee   : > { %v1684_v32 = vadd.f32 %v1683_v31, %v1665_v25 }
 0x4f0   : > { %v1686_v33 = vmax.f32 %v1684_v32, 0.0 }
 0x4f2   : > { %1720 = vmatmul.f32.vlgmr.msra.gmra.mxu3 %v1686_v33 }
 0x575   : > { %v1721_v35 = vpop.f32.mrf.mxu3 }
 0x576   : > { %v1722_v36 = vadd.f32 %v1721_v35, %v1703_v34 }
 0x578   : > { %1724 = vst [vmem:[%s445_s13] sm:$0x1] %v1722_v36 }
 0x579   : > { %2264 = shalt.err (!%p2261_p8)
}
 0x57a   : > { %2046 = dma.vmem_to_hbm [thread:$0]  (%p2421_p5), %s1737_s3, 16, %s1739_s15, %s1726_s1  }
 0x57b PF: > { %s3152_s29 = sld [smem:[#allocation19_spill]] }
 0x57c   : > { %s3153_s16 = sld [smem:[#allocation17_spill]] }
 0x581   : > { %p2073_p9 = scmp.ge.s32.totalorder %s3152_s29, 2 }
 0x582   : > { %s1750_s30 = sand.u32 1, %s3153_s16  }
 0x583   : > { %p2062_p10 = pnand %p2073_p9, %p2425_p6  ;;  %s1751_s12 = scalar_lea.sflag [#allocation6], %s1750_s30 }
 0x585   : > { %p2063_p11 = pneg %p2062_p10 }
 0x587   : > { %2294 = dma.done.wait (%p2063_p11), %s1751_s12, 16  }
 0x588   : > { %2296 = vsyncadd (%p2063_p11), %s1751_s12, 4294967280  ;;  %s3155_s20 = sld [smem:[#allocation20_spill]]  ;;  %s3158_s17 = smov %s2303_s18 }
 0x589   : > { %s3156_s14 = sld [smem:[#allocation18_spill]] }
 0x58a   : > { %s3157_s19 = sld [smem:[#allocation21_spill]] }
 0x58e   : > { %p24_p12 = scmp.ge.s32.totalorder %s3155_s20, 4  }
 0x58f   : > { %s3159_s18 = smov %s3156_s14 }
 0x590   :  { %26 = sbr.rel (!%p24_p12) target bundleno = 9 (0x9), region = 127 }
 0x595   :  { %1756 = vsyncpa [#allocation5], 1 }
 0x596   :  { %1758 = vsyncpa [#allocation5 + $0x1], 1 }
 0x597   :  { %1759 = vsyncpa [#allocation8], 1 }
 0x598   :  { %1760 = vsyncpa [#allocation11], 1 }
 0x599   :  { %1761 = vsyncpa [#allocation6], 1 }
 0x59a   :  { %1763 = vsyncpa [#allocation6 + $0x1], 1 }

</bundles_post_ra>
